<compile_context>
chip_gen: v7x
topology: tpu7x:2x2x1
jax: 0.10.0
libtpu: 0.0.40
codegen_flags: <defaults>
</compile_context>

<pallas_src>
import functools

import jax
import jax.numpy as jnp
from jax.experimental import pallas as pl
from jax.experimental.pallas import tpu as pltpu


# ----------------------------------------------------------------------------
# Fused VAE forward kernel.
# Ref order: x, (W,shift) per encoder layer, W_ml, b_ml, (W,shift) per decoder
# layer, W_out, b_out, then outputs recon, ml (= [mu | logvar]).
# ----------------------------------------------------------------------------
def _vae_fused_kernel(*refs, n_enc, n_dec, latent_dim):
    x_ref = refs[0]
    idx = 1
    enc_refs = refs[idx: idx + 2 * n_enc]; idx += 2 * n_enc
    wml_ref, bml_ref = refs[idx], refs[idx + 1]; idx += 2
    dec_refs = refs[idx: idx + 2 * n_dec]; idx += 2 * n_dec
    wout_ref, bout_ref = refs[idx], refs[idx + 1]; idx += 2
    recon_ref, ml_ref = refs[idx], refs[idx + 1]

    def matmul(h, w_ref):
        # Cast activations to the (bf16) weight dtype at the MXU input only;
        # accumulate and keep the epilogue in f32.
        return jnp.dot(h.astype(w_ref.dtype), w_ref[...],
                       preferred_element_type=jnp.float32)

    h = x_ref[...].astype(jnp.float32)

    # Encoder: Linear+BN folded -> ReLU (Dropout = identity in eval mode).
    for l in range(n_enc):
        w_ref, s_ref = enc_refs[2 * l], enc_refs[2 * l + 1]
        h = jnp.maximum(matmul(h, w_ref) + s_ref[...], 0.0)

    # fc_mu / fc_logvar fused into a single lane-dense (K, 2*latent) matmul.
    ml = matmul(h, wml_ref) + bml_ref[...]
    ml_ref[...] = ml.astype(ml_ref.dtype)

    # Reparameterize (eval mode): z = mu.
    # TODO(synk): training mode z = mu + eps * exp(0.5 * logvar) not implemented.
    z = ml[:, :latent_dim]

    # Decoder: Linear+BN folded -> ReLU, then Linear -> Sigmoid.
    h = z
    for l in range(n_dec):
        w_ref, s_ref = dec_refs[2 * l], dec_refs[2 * l + 1]
        h = jnp.maximum(matmul(h, w_ref) + s_ref[...], 0.0)
    recon = jax.nn.sigmoid(matmul(h, wout_ref) + bout_ref[...])   # EUP exp
    recon_ref[...] = recon.astype(recon_ref.dtype)


# ----------------------------------------------------------------------------
# Wrapper: single fused pallas_call over an optional batch grid.
# ----------------------------------------------------------------------------
def vae_forward(folded, x, *, batch_tile=None):
    B, input_dim = x.shape
    n_enc = len(folded["enc"])
    n_dec = len(folded["dec"])
    latent_dim = folded["ml"][1].shape[1] // 2

    # Batch tiling: single block for small B, 128-row tiles if B scales up.
    if batch_tile is None:
        batch_tile = B if B <= 256 else 128
    assert B % batch_tile == 0, "batch must be divisible by the batch tile"
    grid = (B // batch_tile,)

    flat_params = []
    for (w, s) in folded["enc"]:
        flat_params += [w, s]
    flat_params += list(folded["ml"])
    for (w, s) in folded["dec"]:
        flat_params += [w, s]
    flat_params += list(folded["out"])

    x_spec = pl.BlockSpec((batch_tile, input_dim), lambda i: (i, 0))
    # Weights / shifts: full arrays, same block for every grid step (resident).
    param_specs = [pl.BlockSpec(p.shape, lambda i: (0, 0)) for p in flat_params]
    out_specs = [
        pl.BlockSpec((batch_tile, input_dim), lambda i: (i, 0)),
        pl.BlockSpec((batch_tile, 2 * latent_dim), lambda i: (i, 0)),
    ]
    out_shape = [
        jax.ShapeDtypeStruct((B, input_dim), jnp.float32),
        jax.ShapeDtypeStruct((B, 2 * latent_dim), jnp.float32),
    ]

    # Advisory cost estimate: tiny, bandwidth-shaped custom call.
    weights = [p for p in flat_params if p.ndim == 2 and p.shape[0] > 1]
    flops = sum(2 * B * w.shape[0] * w.shape[1] for w in weights)
    bytes_accessed = (
        x.size * x.dtype.itemsize
        + sum(p.size * p.dtype.itemsize for p in flat_params)
        + B * input_dim * 4 + B * 2 * latent_dim * 4
    )
    transcendentals = B * input_dim  # one exp per sigmoid output element

    kernel = functools.partial(_vae_fused_kernel, n_enc=n_enc, n_dec=n_dec,
                               latent_dim=latent_dim)
    recon, ml = pl.pallas_call(
        kernel,
        out_shape=out_shape,
        grid=grid,
        in_specs=[x_spec] + param_specs,
        out_specs=out_specs,
        compiler_params=pltpu.CompilerParams(
            dimension_semantics=("parallel",),
            vmem_limit_bytes=16 * 1024 * 1024,
        ),
        cost_estimate=pl.CostEstimate(
            flops=flops,
            transcendentals=transcendentals,
            bytes_accessed=bytes_accessed,
        ),
    )(x, *flat_params)

    mu = ml[:, :latent_dim]
    logvar = ml[:, latent_dim:]
    return recon, mu, logvar


# ----------------------------------------------------------------------------
# Deterministic parameter construction (mimics shapes of the PyTorch module)
# ----------------------------------------------------------------------------
def _init_linear(key, in_dim, out_dim):
    kw, kb = jax.random.split(key)
    bound = 1.0 / jnp.sqrt(in_dim)
    w = jax.random.uniform(kw, (in_dim, out_dim), jnp.float32, -bound, bound)
    b = jax.random.uniform(kb, (1, out_dim), jnp.float32, -bound, bound)
    return w, b


def _init_bn_eval(key, dim, eps=1e-5):
    kg, kb, km, kv = jax.random.split(key, 4)
    gamma = 1.0 + 0.1 * jax.random.normal(kg, (1, dim), jnp.float32)
    beta = 0.1 * jax.random.normal(kb, (1, dim), jnp.float32)
    run_mean = 0.1 * jax.random.normal(km, (1, dim), jnp.float32)
    run_var = 1.0 + 0.1 * jnp.abs(jax.random.normal(kv, (1, dim), jnp.float32))
    scale = gamma / jnp.sqrt(run_var + eps)
    shift = beta - run_mean * scale
    return scale, shift


def make_vae_params(key, input_dim, hidden_dims=(512, 256), latent_dim=64):
    params = {}
    enc = []
    prev = input_dim
    for h in hidden_dims:
        key, k1, k2 = jax.random.split(key, 3)
        w, b = _init_linear(k1, prev, h)
        scale, shift = _init_bn_eval(k2, h)
        enc.append((w, b, scale, shift))
        prev = h
    params["encoder"] = enc
    key, k_mu, k_lv = jax.random.split(key, 3)
    params["fc_mu"] = _init_linear(k_mu, prev, latent_dim)
    params["fc_logvar"] = _init_linear(k_lv, prev, latent_dim)
    dec = []
    prev = latent_dim
    for h in reversed(hidden_dims):
        key, k1, k2 = jax.random.split(key, 3)
        w, b = _init_linear(k1, prev, h)
        scale, shift = _init_bn_eval(k2, h)
        dec.append((w, b, scale, shift))
        prev = h
    params["decoder"] = dec
    key, k_out = jax.random.split(key)
    params["dec_out"] = _init_linear(k_out, prev, input_dim)
    return params


def fold_vae_params(raw, weight_dtype=jnp.bfloat16):
    """Fold bias + BatchNorm(eval) into weights; fuse fc_mu/fc_logvar.

    All folding is done in f32; only the final weight matrices are cast to
    `weight_dtype` (bf16) for the MXU/DMA.  Shifts stay f32.
    """
    def fold_bn(w, b, scale, shift):
        w_f = (w * scale).astype(weight_dtype)                 # column-wise
        s_f = (b * scale + shift).astype(jnp.float32)
        return w_f, s_f

    folded = {}
    folded["enc"] = [fold_bn(*layer) for layer in raw["encoder"]]
    w_mu, b_mu = raw["fc_mu"]
    w_lv, b_lv = raw["fc_logvar"]
    folded["ml"] = (jnp.concatenate([w_mu, w_lv], axis=1).astype(weight_dtype),
                    jnp.concatenate([b_mu, b_lv], axis=1).astype(jnp.float32))
    folded["dec"] = [fold_bn(*layer) for layer in raw["decoder"]]
    w_o, b_o = raw["dec_out"]
    folded["out"] = (w_o.astype(weight_dtype), b_o.astype(jnp.float32))
    return folded


# ----------------------------------------------------------------------------
# Pure-JAX reference (mirrors the kernel's bf16 weight / f32 accumulate math)
# ----------------------------------------------------------------------------
def vae_forward_ref(folded, x):
    def mm(h, w):
        return jnp.dot(h.astype(w.dtype).astype(jnp.float32),
                       w.astype(jnp.float32),
                       precision=jax.lax.Precision.HIGHEST)

    h = x.astype(jnp.float32)
    for (w, s) in folded["enc"]:
        h = jnp.maximum(mm(h, w) + s, 0.0)
    wml, bml = folded["ml"]
    ml = mm(h, wml) + bml
    latent = bml.shape[1] // 2
    mu, logvar = ml[:, :latent], ml[:, latent:]
    h = mu                                   # eval-mode reparameterize
    for (w, s) in folded["dec"]:
        h = jnp.maximum(mm(h, w) + s, 0.0)
    wo, bo = folded["out"]
    recon = jax.nn.sigmoid(mm(h, wo) + bo)
    return recon, mu, logvar


if __name__ == "__main__":
    INPUT_DIM = 256
    HIDDEN_DIMS = (512, 256)
    LATENT_DIM = 64
    BATCH = 8

    key = jax.random.PRNGKey(0)
    key_params, key_x = jax.random.split(key)
    raw_params = make_vae_params(key_params, INPUT_DIM, HIDDEN_DIMS, LATENT_DIM)
    folded = fold_vae_params(raw_params, weight_dtype=jnp.bfloat16)
    x = jax.random.uniform(key_x, (BATCH, INPUT_DIM), jnp.float32)

    fwd = jax.jit(vae_forward)
    recon, mu, logvar = fwd(folded, x)
    jax.block_until_ready((recon, mu, logvar))

    r_ref, mu_ref, lv_ref = vae_forward_ref(folded, x)
    assert recon.shape == (BATCH, INPUT_DIM)
    assert mu.shape == (BATCH, LATENT_DIM)
    assert logvar.shape == (BATCH, LATENT_DIM)
    assert jnp.allclose(recon, r_ref, atol=2e-3), "recon mismatch"
    assert jnp.allclose(mu, mu_ref, atol=2e-3), "mu mismatch"
    assert jnp.allclose(logvar, lv_ref, atol=2e-3), "logvar mismatch"

    print("KERNEL_OK")
</pallas_src>

<mosaic_0001>
module attributes {stable_mosaic.version = 11 : i64} {
  func.func @_vae_fused_kernel(%arg0: i32, %arg1: memref<8x256xf32, #tpu.memory_space<vmem>>, %arg2: memref<256x512xbf16, #tpu.memory_space<vmem>>, %arg3: memref<1x512xf32, #tpu.memory_space<vmem>>, %arg4: memref<512x256xbf16, #tpu.memory_space<vmem>>, %arg5: memref<1x256xf32, #tpu.memory_space<vmem>>, %arg6: memref<256x128xbf16, #tpu.memory_space<vmem>>, %arg7: memref<1x128xf32, #tpu.memory_space<vmem>>, %arg8: memref<64x256xbf16, #tpu.memory_space<vmem>>, %arg9: memref<1x256xf32, #tpu.memory_space<vmem>>, %arg10: memref<256x512xbf16, #tpu.memory_space<vmem>>, %arg11: memref<1x512xf32, #tpu.memory_space<vmem>>, %arg12: memref<512x256xbf16, #tpu.memory_space<vmem>>, %arg13: memref<1x256xf32, #tpu.memory_space<vmem>>, %arg14: memref<8x256xf32, #tpu.memory_space<vmem>>, %arg15: memref<8x128xf32, #tpu.memory_space<vmem>>) attributes {dimension_semantics = [#tpu.dimension_semantics<parallel>], iteration_bounds = array<i64: 1>, scalar_prefetch = 0 : i64, scratch_operands = 0 : i64, tpu.core_type = #tpu.core_type<tc>, window_params = [{transform_indices = @transform_0, window_bounds = array<i64: 8, 256>}, {pipeline_mode = #tpu.pipeline_mode<synchronous>, transform_indices = @transform_1, window_bounds = array<i64: 256, 512>}, {pipeline_mode = #tpu.pipeline_mode<synchronous>, transform_indices = @transform_2, window_bounds = array<i64: 1, 512>}, {pipeline_mode = #tpu.pipeline_mode<synchronous>, transform_indices = @transform_3, window_bounds = array<i64: 512, 256>}, {pipeline_mode = #tpu.pipeline_mode<synchronous>, transform_indices = @transform_4, window_bounds = array<i64: 1, 256>}, {pipeline_mode = #tpu.pipeline_mode<synchronous>, transform_indices = @transform_5, window_bounds = array<i64: 256, 128>}, {pipeline_mode = #tpu.pipeline_mode<synchronous>, transform_indices = @transform_6, window_bounds = array<i64: 1, 128>}, {pipeline_mode = #tpu.pipeline_mode<synchronous>, transform_indices = @transform_7, window_bounds = array<i64: 64, 256>}, {pipeline_mode = #tpu.pipeline_mode<synchronous>, transform_indices = @transform_8, window_bounds = array<i64: 1, 256>}, {pipeline_mode = #tpu.pipeline_mode<synchronous>, transform_indices = @transform_9, window_bounds = array<i64: 256, 512>}, {pipeline_mode = #tpu.pipeline_mode<synchronous>, transform_indices = @transform_10, window_bounds = array<i64: 1, 512>}, {pipeline_mode = #tpu.pipeline_mode<synchronous>, transform_indices = @transform_11, window_bounds = array<i64: 512, 256>}, {pipeline_mode = #tpu.pipeline_mode<synchronous>, transform_indices = @transform_12, window_bounds = array<i64: 1, 256>}, {transform_indices = @transform_13, window_bounds = array<i64: 8, 256>}, {transform_indices = @transform_14, window_bounds = array<i64: 8, 128>}]} {
    %c0 = arith.constant 0 : index
    %c0_0 = arith.constant 0 : index
    %0 = vector.load %arg1[%c0, %c0_0] : memref<8x256xf32, #tpu.memory_space<vmem>>, vector<8x256xf32>
    %1 = arith.truncf %0 : vector<8x256xf32> to vector<8x256xbf16>
    %c0_1 = arith.constant 0 : index
    %c0_2 = arith.constant 0 : index
    %2 = vector.load %arg2[%c0_1, %c0_2] : memref<256x512xbf16, #tpu.memory_space<vmem>>, vector<256x512xbf16>
    %cst = arith.constant dense<0.000000e+00> : vector<8x512xf32>
    %3 = tpu.matmul %1, %2, %cst {dimension_numbers = #tpu.dot_dimension_numbers<[1], [0], [0], [1], [0, 0, 1, 1], [], []>} : vector<8x256xbf16>, vector<256x512xbf16>, vector<8x512xf32> -> vector<8x512xf32>
    %c0_3 = arith.constant 0 : index
    %c0_4 = arith.constant 0 : index
    %4 = vector.load %arg3[%c0_3, %c0_4] : memref<1x512xf32, #tpu.memory_space<vmem>>, vector<1x512xf32>
    %5 = vector.broadcast %4 : vector<1x512xf32> to vector<8x512xf32>
    %6 = arith.addf %3, %5 : vector<8x512xf32>
    %cst_5 = arith.constant 0.000000e+00 : f32
    %7 = vector.broadcast %cst_5 : f32 to vector<8x512xf32>
    %8 = arith.maximumf %6, %7 : vector<8x512xf32>
    %9 = arith.truncf %8 : vector<8x512xf32> to vector<8x512xbf16>
    %c0_6 = arith.constant 0 : index
    %c0_7 = arith.constant 0 : index
    %10 = vector.load %arg4[%c0_6, %c0_7] : memref<512x256xbf16, #tpu.memory_space<vmem>>, vector<512x256xbf16>
    %cst_8 = arith.constant dense<0.000000e+00> : vector<8x256xf32>
    %11 = tpu.matmul %9, %10, %cst_8 {dimension_numbers = #tpu.dot_dimension_numbers<[1], [0], [0], [1], [0, 0, 1, 1], [], []>} : vector<8x512xbf16>, vector<512x256xbf16>, vector<8x256xf32> -> vector<8x256xf32>
    %c0_9 = arith.constant 0 : index
    %c0_10 = arith.constant 0 : index
    %12 = vector.load %arg5[%c0_9, %c0_10] : memref<1x256xf32, #tpu.memory_space<vmem>>, vector<1x256xf32>
    %13 = vector.broadcast %12 : vector<1x256xf32> to vector<8x256xf32>
    %14 = arith.addf %11, %13 : vector<8x256xf32>
    %cst_11 = arith.constant 0.000000e+00 : f32
    %15 = vector.broadcast %cst_11 : f32 to vector<8x256xf32>
    %16 = arith.maximumf %14, %15 : vector<8x256xf32>
    %17 = arith.truncf %16 : vector<8x256xf32> to vector<8x256xbf16>
    %c0_12 = arith.constant 0 : index
    %c0_13 = arith.constant 0 : index
    %18 = vector.load %arg6[%c0_12, %c0_13] : memref<256x128xbf16, #tpu.memory_space<vmem>>, vector<256x128xbf16>
    %cst_14 = arith.constant dense<0.000000e+00> : vector<8x128xf32>
    %19 = tpu.matmul %17, %18, %cst_14 {dimension_numbers = #tpu.dot_dimension_numbers<[1], [0], [0], [1], [0, 0, 1, 1], [], []>} : vector<8x256xbf16>, vector<256x128xbf16>, vector<8x128xf32> -> vector<8x128xf32>
    %c0_15 = arith.constant 0 : index
    %c0_16 = arith.constant 0 : index
    %20 = vector.load %arg7[%c0_15, %c0_16] : memref<1x128xf32, #tpu.memory_space<vmem>>, vector<1x128xf32>
    %21 = vector.broadcast %20 : vector<1x128xf32> to vector<8x128xf32>
    %22 = arith.addf %19, %21 : vector<8x128xf32>
    %c0_17 = arith.constant 0 : index
    %c0_18 = arith.constant 0 : index
    %23 = vector.load %arg15[%c0_17, %c0_18] : memref<8x128xf32, #tpu.memory_space<vmem>>, vector<8x128xf32>
    tpu.vector_store %arg15[%c0_17, %c0_18], %22 {strides = array<i32>} : memref<8x128xf32, #tpu.memory_space<vmem>>, vector<8x128xf32>,
    %24 = vector.extract_strided_slice %22 {offsets = [0, 0], sizes = [8, 64], strides = [1, 1]} : vector<8x128xf32> to vector<8x64xf32>
    %25 = arith.truncf %24 : vector<8x64xf32> to vector<8x64xbf16>
    %c0_19 = arith.constant 0 : index
    %c0_20 = arith.constant 0 : index
    %26 = vector.load %arg8[%c0_19, %c0_20] : memref<64x256xbf16, #tpu.memory_space<vmem>>, vector<64x256xbf16>
    %cst_21 = arith.constant dense<0.000000e+00> : vector<8x256xf32>
    %27 = tpu.matmul %25, %26, %cst_21 {dimension_numbers = #tpu.dot_dimension_numbers<[1], [0], [0], [1], [0, 0, 1, 1], [], []>} : vector<8x64xbf16>, vector<64x256xbf16>, vector<8x256xf32> -> vector<8x256xf32>
    %c0_22 = arith.constant 0 : index
    %c0_23 = arith.constant 0 : index
    %28 = vector.load %arg9[%c0_22, %c0_23] : memref<1x256xf32, #tpu.memory_space<vmem>>, vector<1x256xf32>
    %29 = vector.broadcast %28 : vector<1x256xf32> to vector<8x256xf32>
    %30 = arith.addf %27, %29 : vector<8x256xf32>
    %cst_24 = arith.constant 0.000000e+00 : f32
    %31 = vector.broadcast %cst_24 : f32 to vector<8x256xf32>
    %32 = arith.maximumf %30, %31 : vector<8x256xf32>
    %33 = arith.truncf %32 : vector<8x256xf32> to vector<8x256xbf16>
    %c0_25 = arith.constant 0 : index
    %c0_26 = arith.constant 0 : index
    %34 = vector.load %arg10[%c0_25, %c0_26] : memref<256x512xbf16, #tpu.memory_space<vmem>>, vector<256x512xbf16>
    %cst_27 = arith.constant dense<0.000000e+00> : vector<8x512xf32>
    %35 = tpu.matmul %33, %34, %cst_27 {dimension_numbers = #tpu.dot_dimension_numbers<[1], [0], [0], [1], [0, 0, 1, 1], [], []>} : vector<8x256xbf16>, vector<256x512xbf16>, vector<8x512xf32> -> vector<8x512xf32>
    %c0_28 = arith.constant 0 : index
    %c0_29 = arith.constant 0 : index
    %36 = vector.load %arg11[%c0_28, %c0_29] : memref<1x512xf32, #tpu.memory_space<vmem>>, vector<1x512xf32>
    %37 = vector.broadcast %36 : vector<1x512xf32> to vector<8x512xf32>
    %38 = arith.addf %35, %37 : vector<8x512xf32>
    %cst_30 = arith.constant 0.000000e+00 : f32
    %39 = vector.broadcast %cst_30 : f32 to vector<8x512xf32>
    %40 = arith.maximumf %38, %39 : vector<8x512xf32>
    %41 = arith.truncf %40 : vector<8x512xf32> to vector<8x512xbf16>
    %c0_31 = arith.constant 0 : index
    %c0_32 = arith.constant 0 : index
    %42 = vector.load %arg12[%c0_31, %c0_32] : memref<512x256xbf16, #tpu.memory_space<vmem>>, vector<512x256xbf16>
    %cst_33 = arith.constant dense<0.000000e+00> : vector<8x256xf32>
    %43 = tpu.matmul %41, %42, %cst_33 {dimension_numbers = #tpu.dot_dimension_numbers<[1], [0], [0], [1], [0, 0, 1, 1], [], []>} : vector<8x512xbf16>, vector<512x256xbf16>, vector<8x256xf32> -> vector<8x256xf32>
    %c0_34 = arith.constant 0 : index
    %c0_35 = arith.constant 0 : index
    %44 = vector.load %arg13[%c0_34, %c0_35] : memref<1x256xf32, #tpu.memory_space<vmem>>, vector<1x256xf32>
    %45 = vector.broadcast %44 : vector<1x256xf32> to vector<8x256xf32>
    %46 = arith.addf %43, %45 : vector<8x256xf32>
    %47 = arith.negf %46 : vector<8x256xf32>
    %48 = math.exp %47 : vector<8x256xf32>
    %cst_36 = arith.constant 1.000000e+00 : f32
    %49 = vector.broadcast %cst_36 : f32 to vector<8x256xf32>
    %50 = arith.addf %49, %48 : vector<8x256xf32>
    %51 = arith.divf %49, %50 : vector<8x256xf32>
    %c0_37 = arith.constant 0 : index
    %c0_38 = arith.constant 0 : index
    %52 = vector.load %arg14[%c0_37, %c0_38] : memref<8x256xf32, #tpu.memory_space<vmem>>, vector<8x256xf32>
    tpu.vector_store %arg14[%c0_37, %c0_38], %51 {strides = array<i32>} : memref<8x256xf32, #tpu.memory_space<vmem>>, vector<8x256xf32>,
    return
  }
  func.func @transform_0(%arg0: i32) -> (i32, i32) {
    %c0_i32 = arith.constant 0 : i32
    %c0_i32_0 = arith.constant 0 : i32
    return %arg0, %c0_i32 : i32, i32
  }
  func.func @transform_1(%arg0: i32) -> (i32, i32) {
    %c0_i32 = arith.constant 0 : i32
    %c0_i32_0 = arith.constant 0 : i32
    %c0_i32_1 = arith.constant 0 : i32
    return %c0_i32, %c0_i32_0 : i32, i32
  }
  func.func @transform_2(%arg0: i32) -> (i32, i32) {
    %c0_i32 = arith.constant 0 : i32
    %c0_i32_0 = arith.constant 0 : i32
    %c0_i32_1 = arith.constant 0 : i32
    return %c0_i32, %c0_i32_0 : i32, i32
  }
  func.func @transform_3(%arg0: i32) -> (i32, i32) {
    %c0_i32 = arith.constant 0 : i32
    %c0_i32_0 = arith.constant 0 : i32
    %c0_i32_1 = arith.constant 0 : i32
    return %c0_i32, %c0_i32_0 : i32, i32
  }
  func.func @transform_4(%arg0: i32) -> (i32, i32) {
    %c0_i32 = arith.constant 0 : i32
    %c0_i32_0 = arith.constant 0 : i32
    %c0_i32_1 = arith.constant 0 : i32
    return %c0_i32, %c0_i32_0 : i32, i32
  }
  func.func @transform_5(%arg0: i32) -> (i32, i32) {
    %c0_i32 = arith.constant 0 : i32
    %c0_i32_0 = arith.constant 0 : i32
    %c0_i32_1 = arith.constant 0 : i32
    return %c0_i32, %c0_i32_0 : i32, i32
  }
  func.func @transform_6(%arg0: i32) -> (i32, i32) {
    %c0_i32 = arith.constant 0 : i32
    %c0_i32_0 = arith.constant 0 : i32
    %c0_i32_1 = arith.constant 0 : i32
    return %c0_i32, %c0_i32_0 : i32, i32
  }
  func.func @transform_7(%arg0: i32) -> (i32, i32) {
    %c0_i32 = arith.constant 0 : i32
    %c0_i32_0 = arith.constant 0 : i32
    %c0_i32_1 = arith.constant 0 : i32
    return %c0_i32, %c0_i32_0 : i32, i32
  }
  func.func @transform_8(%arg0: i32) -> (i32, i32) {
    %c0_i32 = arith.constant 0 : i32
    %c0_i32_0 = arith.constant 0 : i32
    %c0_i32_1 = arith.constant 0 : i32
    return %c0_i32, %c0_i32_0 : i32, i32
  }
  func.func @transform_9(%arg0: i32) -> (i32, i32) {
    %c0_i32 = arith.constant 0 : i32
    %c0_i32_0 = arith.constant 0 : i32
    %c0_i32_1 = arith.constant 0 : i32
    return %c0_i32, %c0_i32_0 : i32, i32
  }
  func.func @transform_10(%arg0: i32) -> (i32, i32) {
    %c0_i32 = arith.constant 0 : i32
    %c0_i32_0 = arith.constant 0 : i32
    %c0_i32_1 = arith.constant 0 : i32
    return %c0_i32, %c0_i32_0 : i32, i32
  }
  func.func @transform_11(%arg0: i32) -> (i32, i32) {
    %c0_i32 = arith.constant 0 : i32
    %c0_i32_0 = arith.constant 0 : i32
    %c0_i32_1 = arith.constant 0 : i32
    return %c0_i32, %c0_i32_0 : i32, i32
  }
  func.func @transform_12(%arg0: i32) -> (i32, i32) {
    %c0_i32 = arith.constant 0 : i32
    %c0_i32_0 = arith.constant 0 : i32
    %c0_i32_1 = arith.constant 0 : i32
    return %c0_i32, %c0_i32_0 : i32, i32
  }
  func.func @transform_13(%arg0: i32) -> (i32, i32) {
    %c0_i32 = arith.constant 0 : i32
    %c0_i32_0 = arith.constant 0 : i32
    return %arg0, %c0_i32 : i32, i32
  }
  func.func @transform_14(%arg0: i32) -> (i32, i32) {
    %c0_i32 = arith.constant 0 : i32
    %c0_i32_0 = arith.constant 0 : i32
    return %arg0, %c0_i32 : i32, i32
  }
}

</mosaic_0001>

<bundles_post_ra>
// kernel: vae_forward.1
= control target key start
LH: loop header
LB: loop body
LE: loop exit
PB: predicated region body
PF: predicated region fallthrough
CT: control target
= control target key end

     0   :  { %20 = vsyncpa [#allocation3], 0  ;;  %s3636_s0 = inlined_call_operand.vmem [shape: f32[8,256], index: 0, kind: input, shape index: {}]   ;;  %s3637_s1 = inlined_call_operand.hbm [shape: bf16[256,512], index: 1, kind: input, shape index: {}]   ;;  %s3638_s2 = inlined_call_operand.vmem [shape: f32[1,512], index: 2, kind: input, shape index: {}]   ;;  %s3639_s3 = inlined_call_operand.hbm [shape: bf16[512,256], index: 3, kind: input, shape index: {}]   ;;  %s3640_s4 = inlined_call_operand.vmem [shape: f32[1,256], index: 4, kind: input, shape index: {}]   ;;  %s3641_s5 = inlined_call_operand.hbm [shape: bf16[256,128], index: 5, kind: input, shape index: {}]   ;;  %s3642_s6 = inlined_call_operand.vmem [shape: f32[1,128], index: 6, kind: input, shape index: {}]   ;;  %s3643_s7 = inlined_call_operand.hbm [shape: bf16[64,256], index: 7, kind: input, shape index: {}]   ;;  %s3644_s8 = inlined_call_operand.hbm [shape: f32[1,256], index: 8, kind: input, shape index: {}]   ;;  %s3645_s9 = inlined_call_operand.hbm [shape: bf16[256,512], index: 9, kind: input, shape index: {}]   ;;  %s3646_s10 = inlined_call_operand.vmem [shape: f32[1,512], index: 10, kind: input, shape index: {}]   ;;  %s3647_s11 = inlined_call_operand.hbm [shape: bf16[512,256], index: 11, kind: input, shape index: {}]   ;;  %s3648_s12 = inlined_call_operand.vmem [shape: f32[1,256], index: 12, kind: input, shape index: {}]   ;;  %s3649_s13 = inlined_call_operand.hbm [shape: f32[8,256], index: 13, kind: output, shape index: {0}]   ;;  %s3650_s14 = inlined_call_operand.vmem [shape: f32[8,128], index: 14, kind: output, shape index: {1}]  }
   0x1   :  { %21 = vsyncpa [#allocation6], 0 }
   0x2   :  { %22 = vsyncpa [#allocation9], 0 }
   0x3   :  { %23 = vsyncpa [#allocation12], 0 }
   0x4   :  { %24 = vsyncpa [#allocation4], 0  ;;  %s3358_s29 = smov [#allocation5]   ;;  %s3172_s17 = scalar_lea.hbm %s3639_s3, 8192 }
   0x5   :  { %s46_s30 = sshll.u32 %s3358_s29, 4  ;;  %p3173_p0 = scmp.ne.s32.totalorder %s3639_s3, %s3172_s17  ;;  %s47_s30 = int_to_ptr.vmem [resolvable:$true] %s46_s30 }
   0x6   :  { %p3176_p1 = scmp.lt.u32.totalorder %s3172_s17, %s3639_s3 }
   0x8   :  { %p3178_p2 = pnand %p3176_p1, %p3173_p0 }
   0xa   :  { %3181 = shalt.err (!%p3178_p2)
}
   0xb   :  { %s3182_s22 = scalar_lea.vmem %s47_s30, 8192  ;;  %p3187_p4 = scmp.lt.s32.totalorder %s47_s30, %s47_s30 }
   0xc   :  { %p3183_p3 = scmp.ne.s32.totalorder %s47_s30, %s3182_s22  ;;  %p3188_p5 = scmp.lt.s32.totalorder %s3182_s22, %s3182_s22 }
   0xe   :  { %p3189_p6 = por %p3188_p5, %p3187_p4 }
  0x10   :  { %p3190_p7 = pnand %p3189_p6, %p3183_p3 }
  0x12   :  { %3193 = shalt.err (!%p3190_p7)
}
  0x13   :  { %s3359_s23 = smov 128   ;;  %s3360_s24 = smov 8  }
  0x14   :  { %52 = dma.hbm_to_vmem [thread:$0]  %s3639_s3, 8192, %s47_s30, [#allocation6], %s3359_s23, %s3359_s23, %s3360_s24  }
  0x15   :  { %s3361_s27 = smov [#allocation8]   ;;  %s3194_s16 = scalar_lea.hbm %s3643_s7, 1024 }
  0x16   :  { %s74_s28 = sshll.u32 %s3361_s27, 4  ;;  %p3195_p8 = scmp.ne.s32.totalorder %s3643_s7, %s3194_s16  ;;  %s75_s28 = int_to_ptr.vmem [resolvable:$true] %s74_s28 }
  0x17   :  { %p3198_p9 = scmp.lt.u32.totalorder %s3194_s16, %s3643_s7 }
  0x19   :  { %p3200_p10 = pnand %p3198_p9, %p3195_p8 }
  0x1b   :  { %3203 = shalt.err (!%p3200_p10)
}
  0x1c   :  { %s3204_s21 = scalar_lea.vmem %s75_s28, 1024  ;;  %p3209_p12 = scmp.lt.s32.totalorder %s75_s28, %s75_s28 }
  0x1d   :  { %p3205_p11 = scmp.ne.s32.totalorder %s75_s28, %s3204_s21  ;;  %p3210_p13 = scmp.lt.s32.totalorder %s3204_s21, %s3204_s21 }
  0x1f   :  { %p3211_p0 = por %p3210_p13, %p3209_p12 }
  0x21   :  { %p3212_p1 = pnand %p3211_p0, %p3205_p11 }
  0x23   :  { %3215 = shalt.err (!%p3212_p1)
}
  0x24   :  { %80 = dma.hbm_to_vmem [thread:$0]  %s3643_s7, 1024, %s75_s28, [#allocation9], %s3359_s23, %s3359_s23, %s3360_s24  }
  0x25   :  { %s3362_s22 = smov [#allocation11]   ;;  %s3363_s26 = smov [#allocation2]  }
  0x26   :  { %s96_s25 = sshll.u32 %s3362_s22, 4  ;;  %s32_s27 = sshll.u32 %s3363_s26, 4  ;;  %s97_s25 = int_to_ptr.vmem [resolvable:$true] %s96_s25  ;;  %s3478_s27 = int_to_ptr.vmem [resolvable:$true] %s32_s27 }
  0x27   :  { %s3216_s16 = scalar_lea.hbm %s3645_s9, 8192 }
  0x28   :  { %p3217_p2 = scmp.ne.s32.totalorder %s3645_s9, %s3216_s16  ;;  %p3220_p3 = scmp.lt.u32.totalorder %s3216_s16, %s3645_s9 }
  0x2a   :  { %p3222_p4 = pnand %p3220_p3, %p3217_p2 }
  0x2c   :  { %3225 = shalt.err (!%p3222_p4)
}
  0x2d   :  { %s3226_s7 = scalar_lea.vmem %s97_s25, 8192  ;;  %p3231_p6 = scmp.lt.s32.totalorder %s97_s25, %s97_s25 }
  0x2e   :  { %p3227_p5 = scmp.ne.s32.totalorder %s97_s25, %s3226_s7  ;;  %p3232_p7 = scmp.lt.s32.totalorder %s3226_s7, %s3226_s7 }
  0x30   :  { %p3233_p8 = por %p3232_p7, %p3231_p6 }
  0x32   :  { %p3234_p9 = pnand %p3233_p8, %p3227_p5 }
  0x34   :  { %3237 = shalt.err (!%p3234_p9)
}
  0x35   :  { %s3364_s28 = smov 256   ;;  %s3365_s21 = smov 16  }
  0x36   :  { %102 = dma.hbm_to_vmem [thread:$0]  %s3645_s9, 8192, %s97_s25, [#allocation12], %s3364_s28, %s3364_s28, %s3365_s21  }
  0x37   :  { %s3238_s29 = scalar_lea.hbm %s3637_s1, 8192 }
  0x38   :  { %p3239_p10 = scmp.ne.s32.totalorder %s3637_s1, %s3238_s29  ;;  %p3242_p11 = scmp.lt.u32.totalorder %s3238_s29, %s3637_s1 }
  0x3a   :  { %p3244_p12 = pnand %p3242_p11, %p3239_p10 }
  0x3c   :  { %3247 = shalt.err (!%p3244_p12)
}
  0x3d   :  { %s3248_s19 = scalar_lea.vmem %s3478_s27, 8192  ;;  %p3253_p0 = scmp.lt.s32.totalorder %s3478_s27, %s3478_s27 }
  0x3e   :  { %p3249_p13 = scmp.ne.s32.totalorder %s3478_s27, %s3248_s19  ;;  %p3254_p1 = scmp.lt.s32.totalorder %s3248_s19, %s3248_s19 }
  0x40   :  { %p3255_p2 = por %p3254_p1, %p3253_p0 }
  0x42   :  { %p3256_p3 = pnand %p3255_p2, %p3249_p13 }
  0x44   :  { %3259 = shalt.err (!%p3256_p3)
}
  0x45   :  { %38 = dma.hbm_to_vmem [thread:$0]  %s3637_s1, 8192, %s3478_s27, [#allocation3], %s3364_s28, %s3364_s28, %s3365_s21  }
  0x46   :  { %s3366_s20 = smov [#allocation7]   ;;  %s3260_s22 = scalar_lea.hbm %s3641_s5, 2048 }
  0x47   :  { %s60_s7 = sshll.u32 %s3366_s20, 4  ;;  %p3261_p4 = scmp.ne.s32.totalorder %s3641_s5, %s3260_s22  ;;  %s61_s7 = int_to_ptr.vmem [resolvable:$true] %s60_s7 }
  0x48   :  { %p3264_p5 = scmp.lt.u32.totalorder %s3260_s22, %s3641_s5 }
  0x4a   :  { %p3266_p6 = pnand %p3264_p5, %p3261_p4 }
  0x4c   :  { %3269 = shalt.err (!%p3266_p6)
}
  0x4d   :  { %s3270_s17 = scalar_lea.vmem %s61_s7, 2048  ;;  %p3275_p8 = scmp.lt.s32.totalorder %s61_s7, %s61_s7 }
  0x4e   :  { %p3271_p7 = scmp.ne.s32.totalorder %s61_s7, %s3270_s17  ;;  %p3276_p9 = scmp.lt.s32.totalorder %s3270_s17, %s3270_s17 }
  0x50   :  { %p3277_p10 = por %p3276_p9, %p3275_p8 }
  0x52   :  { %p3278_p11 = pnand %p3277_p10, %p3271_p7 }
  0x54   :  { %3281 = shalt.err (!%p3278_p11)
}
  0x55   :  { %s3367_s1 = smov 64   ;;  %s3368_s27 = smov 4  }
  0x56   :  { %66 = dma.hbm_to_vmem [thread:$0]  %s3641_s5, 2048, %s61_s7, [#allocation6], %s3367_s1, %s3367_s1, %s3368_s27  }
  0x57   :  { %s3369_s18 = smov [#allocation10]   ;;  %s3370_s9 = smov [#allocation13]  }
  0x58   :  { %s87_s19 = sshll.u32 %s3369_s18, 4  ;;  %s110_s25 = sshll.u32 %s3370_s9, 4  ;;  %s88_s19 = int_to_ptr.vmem [resolvable:$true] %s87_s19  ;;  %s111_s25 = int_to_ptr.vmem [resolvable:$true] %s110_s25 }
  0x59   :  { %s3282_s30 = scalar_lea.hbm %s3644_s8, 32 }
  0x5a   :  { %p3283_p12 = scmp.ne.s32.totalorder %s3644_s8, %s3282_s30  ;;  %p3286_p13 = scmp.lt.u32.totalorder %s3282_s30, %s3644_s8 }
  0x5c   :  { %p3288_p0 = pnand %p3286_p13, %p3283_p12 }
  0x5e   :  { %3291 = shalt.err (!%p3288_p0)
}
  0x5f   :  { %s3292_s5 = scalar_lea.vmem %s88_s19, 32  ;;  %p3297_p2 = scmp.lt.s32.totalorder %s88_s19, %s88_s19 }
  0x60   :  { %p3293_p1 = scmp.ne.s32.totalorder %s88_s19, %s3292_s5  ;;  %p3298_p3 = scmp.lt.s32.totalorder %s3292_s5, %s3292_s5 }
  0x62   :  { %p3299_p4 = por %p3298_p3, %p3297_p2 }
  0x64   :  { %p3300_p5 = pnand %p3299_p4, %p3293_p1 }
  0x66   :  { %3303 = shalt.err (!%p3300_p5)
}
  0x67   :  { %90 = dma.hbm_to_vmem [thread:$0]  %s3644_s8, 32, %s88_s19, [#allocation9]  }
  0x68   :  { %s3304_s27 = scalar_lea.hbm %s3647_s11, 8192 }
  0x69   :  { %p3305_p6 = scmp.ne.s32.totalorder %s3647_s11, %s3304_s27  ;;  %p3308_p7 = scmp.lt.u32.totalorder %s3304_s27, %s3647_s11 }
  0x6b   :  { %p3310_p8 = pnand %p3308_p7, %p3305_p6 }
  0x6d   :  { %3313 = shalt.err (!%p3310_p8)
}
  0x6e   :  { %s3314_s20 = scalar_lea.vmem %s111_s25, 8192  ;;  %p3319_p10 = scmp.lt.s32.totalorder %s111_s25, %s111_s25 }
  0x6f   :  { %p3315_p9 = scmp.ne.s32.totalorder %s111_s25, %s3314_s20  ;;  %p3320_p11 = scmp.lt.s32.totalorder %s3314_s20, %s3314_s20 }
  0x71   :  { %p3321_p12 = por %p3320_p11, %p3319_p10 }
  0x73   :  { %p3322_p13 = pnand %p3321_p12, %p3315_p9 }
  0x75   :  { %3325 = shalt.err (!%p3322_p13)
}
  0x76   :  { %116 = dma.hbm_to_vmem [thread:$0]  %s3647_s11, 8192, %s111_s25, [#allocation12], %s3359_s23, %s3359_s23, %s3360_s24  }
  0x77   :  { %3348 = dma.done.wait [#allocation3], 8192  }
  0x78   :  { %3349 = vsyncadd [#allocation3], 4294959104 }
  0x79   :  { %3350 = dma.done.wait [#allocation6], 10240  }
  0x7a   :  { %3351 = vsyncadd [#allocation6], 4294957056 }
  0x7b   :  { %3352 = dma.done.wait [#allocation9], 1056  }
  0x7c   :  { %3353 = vsyncadd [#allocation9], 4294966240 }
  0x7d   :  { %3354 = dma.done.wait [#allocation12], 16384  }
  0x7e   :  { %3355 = vsyncadd [#allocation12], 4294950912  ;;  %v2752_v0 = vld [vmem:[#allocation2 + $0x4] ss:$16 sps:$4 sm:$0xff]   ;;  %v2754_v1 = vld [vmem:[#allocation2] ss:$16 sps:$4 sm:$0xff]  }
  0x7f   :  { %551 = vmatprep.subr.bf16.mxu1 %v2752_v0  ;;  %v2755_v2 = vld [vmem:[#allocation2 + $0x24] ss:$16 sps:$4 sm:$0xff]   ;;  %v2757_v3 = vld [vmem:[#allocation2 + $0x20] ss:$16 sps:$4 sm:$0xff]   ;;  %v142_v13 = vld [vmem:[%s3636_s0 + $0x8] sm:$0xff]  ;;  %vm1360_vm0 = vcmask 523264  }
  0x80   :  { %552 = vmatpush1.bf16.msra.mxu1 %v2754_v1  ;;  %v2758_v4 = vld [vmem:[#allocation2 + $0x44] ss:$16 sps:$4 sm:$0xff]   ;;  %v2760_v5 = vld [vmem:[#allocation2 + $0x40] ss:$16 sps:$4 sm:$0xff]   ;;  %v3551_v14 = vpack.c.bf16 %v142_v13, %v142_v13  ;;  %v2802_v45 = vld [vmem:[#allocation2 + $0xc] ss:$16 sps:$4 sm:$0xff]  }
  0x81   :  { %553 = vmatprep.subr.bf16.mxu1 %v2755_v2  ;;  %v2761_v6 = vld [vmem:[#allocation2 + $0x64] ss:$16 sps:$4 sm:$0xff]   ;;  %v2763_v7 = vld [vmem:[#allocation2 + $0x60] ss:$16 sps:$4 sm:$0xff]   ;;  %v2800_v47 = vld [vmem:[#allocation2 + $0x8] ss:$16 sps:$4 sm:$0xff]  }
  0x82   :  { %v2764_v8 = vld [vmem:[#allocation2 + $0x84] ss:$16 sps:$4 sm:$0xff]   ;;  %v2766_v9 = vld [vmem:[#allocation2 + $0x80] ss:$16 sps:$4 sm:$0xff]   ;;  %583 = vmatprep.mubr.bf16.mxu1 %v3551_v14  ;;  %v2805_v49 = vld [vmem:[#allocation2 + $0x2c] ss:$16 sps:$4 sm:$0xff]  }
  0x83   :  { %v2767_v10 = vld [vmem:[#allocation2 + $0xa4] ss:$16 sps:$4 sm:$0xff]   ;;  %v2769_v11 = vld [vmem:[#allocation2 + $0xa0] ss:$16 sps:$4 sm:$0xff]   ;;  %v2803_v52 = vld [vmem:[#allocation2 + $0x28] ss:$16 sps:$4 sm:$0xff]  }
  0x84   :  { %554 = vmatpush1.bf16.msra.mxu1 %v2757_v3  ;;  %v2770_v12 = vld [vmem:[#allocation2 + $0xc4] ss:$16 sps:$4 sm:$0xff]   ;;  %v2772_v15 = vld [vmem:[#allocation2 + $0xc0] ss:$16 sps:$4 sm:$0xff]   ;;  %v2808_v53 = vld [vmem:[#allocation2 + $0x4c] ss:$16 sps:$4 sm:$0xff]  }
  0x85   :  { %555 = vmatprep.subr.bf16.mxu1 %v2758_v4  ;;  %v2773_v16 = vld [vmem:[#allocation2 + $0xe4] ss:$16 sps:$4 sm:$0xff]   ;;  %v2775_v17 = vld [vmem:[#allocation2 + $0xe0] ss:$16 sps:$4 sm:$0xff]   ;;  %v2806_v56 = vld [vmem:[#allocation2 + $0x48] ss:$16 sps:$4 sm:$0xff]  }
  0x86   :  { %v2776_v18 = vld [vmem:[#allocation2 + $0x104] ss:$16 sps:$4 sm:$0xff]   ;;  %v2778_v19 = vld [vmem:[#allocation2 + $0x100] ss:$16 sps:$4 sm:$0xff]   ;;  %v2811_v57 = vld [vmem:[#allocation2 + $0x6c] ss:$16 sps:$4 sm:$0xff]  }
  0x87   :  { %v2779_v20 = vld [vmem:[#allocation2 + $0x124] ss:$16 sps:$4 sm:$0xff]   ;;  %v2781_v21 = vld [vmem:[#allocation2 + $0x120] ss:$16 sps:$4 sm:$0xff]   ;;  %v2809_v60 = vld [vmem:[#allocation2 + $0x68] ss:$16 sps:$4 sm:$0xff]  }
  0x88   :  { %556 = vmatpush1.bf16.msra.mxu1 %v2760_v5  ;;  %v2782_v22 = vld [vmem:[#allocation2 + $0x144] ss:$16 sps:$4 sm:$0xff]   ;;  %v2784_v23 = vld [vmem:[#allocation2 + $0x140] ss:$16 sps:$4 sm:$0xff]   ;;  %v2814_v61 = vld [vmem:[#allocation2 + $0x8c] ss:$16 sps:$4 sm:$0xff]  }
  0x89   :  { %557 = vmatprep.subr.bf16.mxu1 %v2761_v6  ;;  %v2785_v24 = vld [vmem:[#allocation2 + $0x164] ss:$16 sps:$4 sm:$0xff]   ;;  %v2787_v25 = vld [vmem:[#allocation2 + $0x160] ss:$16 sps:$4 sm:$0xff]   ;;  %v2812_v0 = vld [vmem:[#allocation2 + $0x88] ss:$16 sps:$4 sm:$0xff]  }
  0x8a   :  { %v2788_v26 = vld [vmem:[#allocation2 + $0x184] ss:$16 sps:$4 sm:$0xff]   ;;  %v2850_v28 = vld [vmem:[#allocation5] ss:$8 sps:$4 sm:$0xff]   ;;  %v2853_v31 = vld [vmem:[#allocation5 + $0x10] ss:$8 sps:$4 sm:$0xff]  }
  0x8b   :  { %v2848_v27 = vld [vmem:[#allocation5 + $0x4] ss:$8 sps:$4 sm:$0xff]   ;;  %v2851_v29 = vld [vmem:[#allocation5 + $0x14] ss:$8 sps:$4 sm:$0xff]   ;;  %v2790_v30 = vld [vmem:[#allocation2 + $0x180] ss:$16 sps:$4 sm:$0xff]  }
  0x8c   :  { %558 = vmatpush1.bf16.msra.mxu1 %v2763_v7  ;;  %1037 = vmatprep.subr.bf16.mxu0 %v2848_v27  ;;  %v2791_v32 = vld [vmem:[#allocation2 + $0x1a4] ss:$16 sps:$4 sm:$0xff]   ;;  %v2793_v34 = vld [vmem:[#allocation2 + $0x1a0] ss:$16 sps:$4 sm:$0xff]   ;;  %v2817_v1 = vld [vmem:[#allocation2 + $0xac] ss:$16 sps:$4 sm:$0xff]  }
  0x8d   :  { %559 = vmatprep.subr.bf16.mxu1 %v2764_v8  ;;  %1038 = vmatpush1.bf16.msra.mxu0 %v2850_v28  ;;  %v2854_v33 = vld [vmem:[#allocation5 + $0x24] ss:$8 sps:$4 sm:$0xff]   ;;  %v2856_v35 = vld [vmem:[#allocation5 + $0x20] ss:$8 sps:$4 sm:$0xff]   ;;  %v2857_v37 = vld [vmem:[#allocation5 + $0x34] ss:$8 sps:$4 sm:$0xff]  }
  0x8e   :  { %1039 = vmatprep.subr.bf16.mxu0 %v2851_v29  ;;  %v2794_v36 = vld [vmem:[#allocation2 + $0x1c4] ss:$16 sps:$4 sm:$0xff]   ;;  %v2796_v38 = vld [vmem:[#allocation2 + $0x1c0] ss:$16 sps:$4 sm:$0xff]   ;;  %v2815_v4 = vld [vmem:[#allocation2 + $0xa8] ss:$16 sps:$4 sm:$0xff]  }
  0x8f   :  { %v2859_v39 = vld [vmem:[#allocation5 + $0x30] ss:$8 sps:$4 sm:$0xff]   ;;  %v2797_v40 = vld [vmem:[#allocation2 + $0x1e4] ss:$16 sps:$4 sm:$0xff]   ;;  %v2862_v44 = vld [vmem:[#allocation5 + $0x40] ss:$8 sps:$4 sm:$0xff]  }
  0x90   :  { %560 = vmatpush1.bf16.msra.mxu1 %v2766_v9  ;;  %v2860_v41 = vld [vmem:[#allocation5 + $0x44] ss:$8 sps:$4 sm:$0xff]   ;;  %v2799_v42 = vld [vmem:[#allocation2 + $0x1e0] ss:$16 sps:$4 sm:$0xff]   ;;  %v2863_v46 = vld [vmem:[#allocation5 + $0x54] ss:$8 sps:$4 sm:$0xff]  }
  0x91   :  { %561 = vmatprep.subr.bf16.mxu1 %v2767_v10  ;;  %1040 = vmatpush1.bf16.msra.mxu0 %v2853_v31  ;;  %v141_v43 = vld [vmem:[%s3636_s0] sm:$0xff]  ;;  %v2865_v50 = vld [vmem:[#allocation5 + $0x50] ss:$8 sps:$4 sm:$0xff]   ;;  %v2869_v55 = vld [vmem:[#allocation5 + $0x74] ss:$8 sps:$4 sm:$0xff]  }
  0x92   :  { %1041 = vmatprep.subr.bf16.mxu0 %v2854_v33  ;;  %v3557_v48 = vpack.c.bf16 %v141_v43, %v141_v43  ;;  %v2866_v51 = vld [vmem:[#allocation5 + $0x64] ss:$8 sps:$4 sm:$0xff]   ;;  %v2868_v54 = vld [vmem:[#allocation5 + $0x60] ss:$8 sps:$4 sm:$0xff]   ;;  %v2871_v58 = vld [vmem:[#allocation5 + $0x70] ss:$8 sps:$4 sm:$0xff]  }
  0x93   :  { %v2872_v59 = vld [vmem:[#allocation5 + $0x84] ss:$8 sps:$4 sm:$0xff]   ;;  %v2874_v62 = vld [vmem:[#allocation5 + $0x80] ss:$8 sps:$4 sm:$0xff]   ;;  %v2875_v63 = vld [vmem:[#allocation5 + $0x94] ss:$8 sps:$4 sm:$0xff]  }
  0x94   :  { %562 = vmatpush1.bf16.msra.mxu1 %v2769_v11  ;;  %v2877_v2 = vld [vmem:[#allocation5 + $0x90] ss:$8 sps:$4 sm:$0xff]   ;;  %v2878_v3 = vld [vmem:[#allocation5 + $0xa4] ss:$8 sps:$4 sm:$0xff]   ;;  %v2880_v6 = vld [vmem:[#allocation5 + $0xa0] ss:$8 sps:$4 sm:$0xff]  }
  0x95   :  { %563 = vmatprep.subr.bf16.mxu1 %v2770_v12  ;;  %1042 = vmatpush1.bf16.msra.mxu0 %v2856_v35  ;;  %v2820_v5 = vld [vmem:[#allocation2 + $0xcc] ss:$16 sps:$4 sm:$0xff]   ;;  %v2818_v8 = vld [vmem:[#allocation2 + $0xc8] ss:$16 sps:$4 sm:$0xff]  }
  0x96   :  { %1043 = vmatprep.subr.bf16.mxu0 %v2857_v37  ;;  %v2881_v7 = vld [vmem:[#allocation5 + $0xb4] ss:$8 sps:$4 sm:$0xff]   ;;  %v2883_v10 = vld [vmem:[#allocation5 + $0xb0] ss:$8 sps:$4 sm:$0xff]   ;;  %v2884_v11 = vld [vmem:[#allocation5 + $0xc4] ss:$8 sps:$4 sm:$0xff]   ;;  %v211_v37 = vlaneseq }
  0x97   :  { %v2823_v9 = vld [vmem:[#allocation2 + $0xec] ss:$16 sps:$4 sm:$0xff]   ;;  %v2821_v12 = vld [vmem:[#allocation2 + $0xe8] ss:$16 sps:$4 sm:$0xff]  }
  0x98   :  { %564 = vmatpush1.bf16.msra.mxu1 %v2772_v15  ;;  %v2826_v13 = vld [vmem:[#allocation2 + $0x10c] ss:$16 sps:$4 sm:$0xff]   ;;  %v2839_v27 = vld [vmem:[#allocation2 + $0x1a8] ss:$16 sps:$4 sm:$0xff]  }
  0x99   :  { %565 = vmatprep.subr.bf16.mxu1 %v2773_v16  ;;  %1044 = vmatpush1.bf16.msra.mxu0 %v2859_v39  ;;  %v2887_v15 = vld [vmem:[#allocation5 + $0xd4] ss:$8 sps:$4 sm:$0xff]   ;;  %v2824_v16 = vld [vmem:[#allocation2 + $0x108] ss:$16 sps:$4 sm:$0xff]  }
  0x9a   :  { %1045 = vmatprep.subr.bf16.mxu0 %v2860_v41  ;;  %v2844_v28 = vld [vmem:[#allocation2 + $0x1cc] ss:$16 sps:$4 sm:$0xff]   ;;  %v2842_v29 = vld [vmem:[#allocation2 + $0x1c8] ss:$16 sps:$4 sm:$0xff]  }
  0x9b   :  { %v2845_v31 = vld [vmem:[#allocation2 + $0x1e8] ss:$16 sps:$4 sm:$0xff]  }
  0x9c   :  { %566 = vmatpush1.bf16.msra.mxu1 %v2775_v17  ;;  %v2829_v17 = vld [vmem:[#allocation2 + $0x12c] ss:$16 sps:$4 sm:$0xff]   ;;  %v2892_v33 = vld [vmem:[#allocation5 + $0xe0] ss:$8 sps:$4 sm:$0xff]   ;;  %v2895_v35 = vld [vmem:[#allocation5 + $0xf0] ss:$8 sps:$4 sm:$0xff]  }
  0x9d   :  { %567 = vmatprep.subr.bf16.mxu1 %v2776_v18  ;;  %1046 = vmatpush1.bf16.msra.mxu0 %v2862_v44  ;;  %v2889_v18 = vld [vmem:[#allocation5 + $0xd0] ss:$8 sps:$4 sm:$0xff]  }
  0x9e   :  { %1047 = vmatprep.subr.bf16.mxu0 %v2863_v46 }
  0xa0   :  { %568 = vmatpush1.bf16.msra.mxu1 %v2778_v19  ;;  %v2827_v19 = vld [vmem:[#allocation2 + $0x128] ss:$16 sps:$4 sm:$0xff]  }
  0xa1   :  { %569 = vmatprep.subr.bf16.mxu1 %v2779_v20  ;;  %1048 = vmatpush1.bf16.msra.mxu0 %v2865_v50  ;;  %v2832_v20 = vld [vmem:[#allocation2 + $0x14c] ss:$16 sps:$4 sm:$0xff]  }
  0xa2   :  { %1049 = vmatprep.subr.bf16.mxu0 %v2866_v51 }
  0xa4   :  { %570 = vmatpush1.bf16.msra.mxu1 %v2781_v21  ;;  %v2830_v21 = vld [vmem:[#allocation2 + $0x148] ss:$16 sps:$4 sm:$0xff]  }
  0xa5   :  { %571 = vmatprep.subr.bf16.mxu1 %v2782_v22  ;;  %1050 = vmatpush1.bf16.msra.mxu0 %v2868_v54  ;;  %v2835_v22 = vld [vmem:[#allocation2 + $0x16c] ss:$16 sps:$4 sm:$0xff]   ;;  %v2896_v54 = vld [vmem:[#allocation5 + $0x100] ss:$8 sps:$4 sm:$0xff]  }
  0xa6   :  { %1051 = vmatprep.subr.bf16.mxu0 %v2869_v55  ;;  %v2901_v55 = vld [vmem:[#allocation5 + $0x114] ss:$8 sps:$4 sm:$0xff]  }
  0xa8   :  { %572 = vmatpush1.bf16.msra.mxu1 %v2784_v23  ;;  %v2833_v23 = vld [vmem:[#allocation2 + $0x168] ss:$16 sps:$4 sm:$0xff]  }
  0xa9   :  { %573 = vmatprep.subr.bf16.mxu1 %v2785_v24  ;;  %1052 = vmatpush1.bf16.msra.mxu0 %v2871_v58  ;;  %v2838_v24 = vld [vmem:[#allocation2 + $0x18c] ss:$16 sps:$4 sm:$0xff]   ;;  %v2902_v58 = vld [vmem:[#allocation5 + $0x120] ss:$8 sps:$4 sm:$0xff]  }
  0xaa   :  { %1053 = vmatprep.subr.bf16.mxu0 %v2872_v59  ;;  %v2907_v59 = vld [vmem:[#allocation5 + $0x134] ss:$8 sps:$4 sm:$0xff]  }
  0xac   :  { %574 = vmatpush1.bf16.msra.mxu1 %v2787_v25  ;;  %v2836_v25 = vld [vmem:[#allocation2 + $0x188] ss:$16 sps:$4 sm:$0xff]  }
  0xad   :  { %575 = vmatprep.subr.bf16.mxu1 %v2788_v26  ;;  %1054 = vmatpush1.bf16.msra.mxu0 %v2874_v62  ;;  %v2841_v26 = vld [vmem:[#allocation2 + $0x1ac] ss:$16 sps:$4 sm:$0xff]   ;;  %v2908_v62 = vld [vmem:[#allocation5 + $0x140] ss:$8 sps:$4 sm:$0xff]  }
  0xae   :  { %1055 = vmatprep.subr.bf16.mxu0 %v2875_v63  ;;  %v2913_v63 = vld [vmem:[#allocation5 + $0x154] ss:$8 sps:$4 sm:$0xff]  }
  0xb0   :  { %576 = vmatpush1.bf16.msra.mxu1 %v2790_v30  ;;  %v2847_v30 = vld [vmem:[#allocation2 + $0x1ec] ss:$16 sps:$4 sm:$0xff]  }
  0xb1   :  { %577 = vmatprep.subr.bf16.mxu1 %v2791_v32  ;;  %1056 = vmatpush1.bf16.msra.mxu0 %v2877_v2  ;;  %v2890_v32 = vld [vmem:[#allocation5 + $0xe4] ss:$8 sps:$4 sm:$0xff]   ;;  %v2914_v2 = vld [vmem:[#allocation5 + $0x160] ss:$8 sps:$4 sm:$0xff]  }
  0xb2   :  { %1057 = vmatprep.subr.bf16.mxu0 %v2878_v3  ;;  %v2919_v3 = vld [vmem:[#allocation5 + $0x174] ss:$8 sps:$4 sm:$0xff]  }
  0xb4   :  { %578 = vmatpush1.bf16.msra.mxu1 %v2793_v34  ;;  %v2893_v34 = vld [vmem:[#allocation5 + $0xf4] ss:$8 sps:$4 sm:$0xff]  }
  0xb5   :  { %579 = vmatprep.subr.bf16.mxu1 %v2794_v36  ;;  %1058 = vmatpush1.bf16.msra.mxu0 %v2880_v6  ;;  %v2898_v36 = vld [vmem:[#allocation5 + $0x104] ss:$8 sps:$4 sm:$0xff]   ;;  %v2920_v6 = vld [vmem:[#allocation5 + $0x180] ss:$8 sps:$4 sm:$0xff]  }
  0xb6   :  { %1059 = vmatprep.subr.bf16.mxu0 %v2881_v7  ;;  %v2925_v7 = vld [vmem:[#allocation5 + $0x194] ss:$8 sps:$4 sm:$0xff]  }
  0xb8   :  { %580 = vmatpush1.bf16.msra.mxu1 %v2796_v38  ;;  %v3562_v38 = vshrl.u32 %v211_v37, 7  ;;  %v2946_v37 = vld [vmem:[#allocation7 + $0x48] sm:$0xff]  }
  0xb9   :  { %581 = vmatprep.subr.bf16.mxu1 %v2797_v40  ;;  %1060 = vmatpush1.bf16.msra.mxu0 %v2883_v10  ;;  %v3570_v40 = vld [vmem:[%s3638_s2] sm:$0xf] }
  0xba   :  { %1061 = vmatprep.subr.bf16.mxu0 %v2884_v11  ;;  %v3565_v39 = vsub.s32 0, %v3562_v38  ;;  %v3573_v41 = vsub.s32 1, %v3562_v38  ;;  %v2926_v10 = vld [vmem:[#allocation5 + $0x1a0] ss:$8 sps:$4 sm:$0xff]   ;;  %v2931_v11 = vld [vmem:[#allocation5 + $0x1b4] ss:$8 sps:$4 sm:$0xff]  }
  0xbc   :  { %582 = vmatpush1.bf16.msra.mxu1 %v2799_v42  ;;  %v214_v42 = vrot.slane %v3570_v40, %v3565_v39  ;;  %v218_v43 = vrot.slane %v3570_v40, %v3573_v41 }
  0xbd   :  { %592 = vmatprep.subr.bf16.mxu1 %v2802_v45 }
  0xbf   :  { %584 = vmatmul.mubr.bf16.vlgmr.msra.gmra.mrb[0].mxu1 %v3557_v48 }
  0xc0   :  { %593 = vmatpush1.bf16.msra.mxu1 %v2800_v47  ;;  %624 = vmatprep.mubr.bf16.mxu1 %v3551_v14  ;;  %v2886_v14 = vld [vmem:[#allocation5 + $0xc0] ss:$8 sps:$4 sm:$0xff]  }
  0xc1   :  { %594 = vmatprep.subr.bf16.mxu1 %v2805_v49  ;;  %1062 = vmatpush1.bf16.msra.mxu0 %v2886_v14  ;;  %v2932_v14 = vld [vmem:[#allocation5 + $0x1c0] ss:$8 sps:$4 sm:$0xff]  }
  0xc2   :  { %1063 = vmatprep.subr.bf16.mxu0 %v2887_v15  ;;  %v2937_v15 = vld [vmem:[#allocation5 + $0x1d4] ss:$8 sps:$4 sm:$0xff]  }
  0xc4   :  { %595 = vmatpush1.bf16.msra.mxu1 %v2803_v52 }
  0xc5   :  { %596 = vmatprep.subr.bf16.mxu1 %v2808_v53  ;;  %1064 = vmatpush1.bf16.msra.mxu0 %v2889_v18  ;;  %v225_v18 = vsub.s32 3, %v3562_v38 }
  0xc6   :  { %1065 = vmatprep.subr.bf16.mxu0 %v2890_v32  ;;  %v2944_v32 = vld [vmem:[#allocation7 + $0x40] sm:$0xff]  }
  0xc8   :  { %597 = vmatpush1.bf16.msra.mxu1 %v2806_v56  ;;  %v2899_v56 = vld [vmem:[#allocation5 + $0x110] ss:$8 sps:$4 sm:$0xff]  }
  0xc9   :  { %598 = vmatprep.subr.bf16.mxu1 %v2811_v57  ;;  %1066 = vmatpush1.bf16.msra.mxu0 %v2892_v33  ;;  %v2904_v57 = vld [vmem:[#allocation5 + $0x124] ss:$8 sps:$4 sm:$0xff]  }
  0xca   :  { %1067 = vmatprep.subr.bf16.mxu0 %v2893_v34 }
  0xcc   :  { %599 = vmatpush1.bf16.msra.mxu1 %v2809_v60  ;;  %v2905_v60 = vld [vmem:[#allocation5 + $0x130] ss:$8 sps:$4 sm:$0xff]  }
  0xcd   :  { %600 = vmatprep.subr.bf16.mxu1 %v2814_v61  ;;  %1068 = vmatpush1.bf16.msra.mxu0 %v2895_v35  ;;  %v2910_v61 = vld [vmem:[#allocation5 + $0x144] ss:$8 sps:$4 sm:$0xff]  }
  0xce   :  { %1078 = vmatprep.subr.bf16.mxu0 %v2898_v36  ;;  %v2945_v35 = vld [vmem:[#allocation7] sm:$0xff]  }
  0xd0   :  { %601 = vmatpush1.bf16.msra.mxu1 %v2812_v0  ;;  %v2911_v0 = vld [vmem:[#allocation5 + $0x150] ss:$8 sps:$4 sm:$0xff]  }
  0xd1   :  { %602 = vmatprep.subr.bf16.mxu1 %v2817_v1  ;;  %v2916_v1 = vld [vmem:[#allocation5 + $0x164] ss:$8 sps:$4 sm:$0xff]  }
  0xd4   :  { %603 = vmatpush1.bf16.msra.mxu1 %v2815_v4  ;;  %v2917_v4 = vld [vmem:[#allocation5 + $0x170] ss:$8 sps:$4 sm:$0xff]  }
  0xd5   :  { %604 = vmatprep.subr.bf16.mxu1 %v2820_v5  ;;  %v2922_v5 = vld [vmem:[#allocation5 + $0x184] ss:$8 sps:$4 sm:$0xff]  }
  0xd8   :  { %605 = vmatpush1.bf16.msra.mxu1 %v2818_v8  ;;  %v2923_v8 = vld [vmem:[#allocation5 + $0x190] ss:$8 sps:$4 sm:$0xff]  }
  0xd9   :  { %606 = vmatprep.subr.bf16.mxu1 %v2823_v9  ;;  %v2928_v9 = vld [vmem:[#allocation5 + $0x1a4] ss:$8 sps:$4 sm:$0xff]  }
  0xdc   :  { %607 = vmatpush1.bf16.msra.mxu1 %v2821_v12  ;;  %v2929_v12 = vld [vmem:[#allocation5 + $0x1b0] ss:$8 sps:$4 sm:$0xff]  }
  0xdd   :  { %608 = vmatprep.subr.bf16.mxu1 %v2826_v13  ;;  %v2934_v13 = vld [vmem:[#allocation5 + $0x1c4] ss:$8 sps:$4 sm:$0xff]  }
  0xe0   :  { %609 = vmatpush1.bf16.msra.mxu1 %v2824_v16  ;;  %v221_v16 = vsub.s32 2, %v3562_v38  ;;  %v1969_v38 = vld [vmem:[%s3648_s12] sm:$0x3]  ;;  %s3372_s12 = smov [#allocation14]  }
  0xe1   :  { %610 = vmatprep.subr.bf16.mxu1 %v2829_v17  ;;  %v2935_v17 = vld [vmem:[#allocation5 + $0x1d0] ss:$8 sps:$4 sm:$0xff]   ;;  %s2403_s5 = sshll.u32 %s3372_s12, 4  ;;  %s2404_s5 = int_to_ptr.vmem [resolvable:$true] %s2403_s5 }
  0xe2   :  { %s3326_s7 = scalar_lea.vmem %s2404_s5, 256  ;;  %p3331_p1 = scmp.lt.s32.totalorder %s2404_s5, %s2404_s5 }
  0xe3   :  { %p3327_p0 = scmp.ne.s32.totalorder %s2404_s5, %s3326_s7  ;;  %p3332_p2 = scmp.lt.s32.totalorder %s3326_s7, %s3326_s7 }
  0xe4   :  { %611 = vmatpush1.bf16.msra.mxu1 %v2827_v19  ;;  %v2940_v19 = vld [vmem:[#allocation5 + $0x1e4] ss:$8 sps:$4 sm:$0xff]  }
  0xe5   :  { %612 = vmatprep.subr.bf16.mxu1 %v2832_v20  ;;  %v222_v20 = vrot.slane %v3570_v40, %v221_v16  ;;  %p3333_p3 = por %p3332_p2, %p3331_p1 }
  0xe7   :  { %p3334_p4 = pnand %p3333_p3, %p3327_p0 }
  0xe8   :  { %613 = vmatpush1.bf16.msra.mxu1 %v2830_v21  ;;  %v226_v21 = vrot.slane %v3570_v40, %v225_v18  ;;  %v2947_v40 = vld [vmem:[#allocation7 + $0x8] sm:$0xff]  }
  0xe9   :  { %614 = vmatprep.subr.bf16.mxu1 %v2835_v22  ;;  %v2938_v22 = vld [vmem:[#allocation5 + $0x1e0] ss:$8 sps:$4 sm:$0xff]  }
  0xec   :  { %615 = vmatpush1.bf16.msra.mxu1 %v2833_v23  ;;  %v2943_v23 = vld [vmem:[#allocation5 + $0x1f4] ss:$8 sps:$4 sm:$0xff]  }
  0xed   :  { %616 = vmatprep.subr.bf16.mxu1 %v2838_v24 }
  0xf0   :  { %617 = vmatpush1.bf16.msra.mxu1 %v2836_v25 }
  0xf1   :  { %618 = vmatprep.subr.bf16.mxu1 %v2841_v26 }
  0xf4   :  { %619 = vmatpush1.bf16.msra.mxu1 %v2839_v27 }
  0xf5   :  { %620 = vmatprep.subr.bf16.mxu1 %v2844_v28 }
  0xf8   :  { %621 = vmatpush1.bf16.msra.mxu1 %v2842_v29  ;;  %v2941_v29 = vld [vmem:[#allocation5 + $0x1f0] ss:$8 sps:$4 sm:$0xff]  }
  0xf9   :  { %622 = vmatprep.subr.bf16.mxu1 %v2847_v30 }
  0xfc   :  { %623 = vmatpush1.bf16.msra.mxu1 %v2845_v31 }
  0xff   :  { %625 = vmatmul.mubr.bf16.vlgmr.msra.gmra.mrb[4].mxu1 %v3557_v48 }
 0x192   :  { %v585_v44 = vpop.f32.mrb[0].mxu1 }
 0x193   :  { %v586_v45 = vadd.f32 %v585_v44, %v214_v42  ;;  %v587_v46 = vpop.f32.mrb[1].mxu1  ;;  %v2948_v42 = vld [vmem:[#allocation7 + $0x50] sm:$0xff]   ;;  %v2950_v44 = vld [vmem:[#allocation7 + $0x58] sm:$0xff]  }
 0x194   :  { %v588_v47 = vadd.f32 %v587_v46, %v218_v43  ;;  %v589_v48 = vpop.f32.mrb[2].mxu1  ;;  %v2949_v43 = vld [vmem:[#allocation7 + $0x10] sm:$0xff]   ;;  %v2952_v46 = vld [vmem:[#allocation7 + $0x60] sm:$0xff]  }
 0x195   :  { %v633_v49 = vmax.f32 %v586_v45, 0.0  ;;  %v590_v50 = vpop.f32.mrb[3].mxu1  ;;  %v2951_v45 = vld [vmem:[#allocation7 + $0x18] sm:$0xff]   ;;  %v2954_v48 = vld [vmem:[#allocation7 + $0x68] sm:$0xff]  }
 0x196   :  { %v634_v51 = vmax.f32 %v588_v47, 0.0  ;;  %v2953_v47 = vld [vmem:[#allocation7 + $0x20] sm:$0xff]   ;;  %v2956_v50 = vld [vmem:[#allocation7 + $0x70] sm:$0xff]  }
 0x197   :  { %v637_v52 = vpack.c.bf16 %v633_v49, %v633_v49  ;;  %v2955_v49 = vld [vmem:[#allocation7 + $0x28] sm:$0xff]  }
 0x198   :  { %v638_v53 = vpack.c.bf16 %v634_v51, %v634_v51  ;;  %v2957_v51 = vld [vmem:[#allocation7 + $0x30] sm:$0xff]  }
 0x19a   :  { %1069 = vmatprep.mubr.bf16.mxu0 %v638_v53  ;;  %v2959_v53 = vld [vmem:[#allocation7 + $0x38] sm:$0xff]  }
 0x19b   :  { %1070 = vmatmul.mubr.bf16.vlgmr.msra.gmra.mrb[0].mxu0 %v637_v52  ;;  %v2958_v52 = vld [vmem:[#allocation7 + $0x78] sm:$0xff]  }
 0x19c   :  { %1079 = vmatpush1.bf16.msra.mxu0 %v2896_v54  ;;  %v2960_v54 = vld [vmem:[#allocation8] ss:$8 sps:$4 sm:$0xff]  }
 0x19d   :  { %1080 = vmatprep.subr.bf16.mxu0 %v2901_v55  ;;  %v2962_v55 = vld [vmem:[#allocation8 + $0x4] ss:$8 sps:$4 sm:$0xff]  }
 0x19e   :  { %1364 = vmatprep.subr.bf16.mxu1 %v2962_v55  ;;  %v3019_v55 = vld [vmem:[#allocation11 + $0x1e4] ss:$16 sps:$4 sm:$0xff]  }
 0x19f   :  { %1365 = vmatpush1.bf16.msra.mxu1 %v2960_v54  ;;  %v3014_v54 = vld [vmem:[#allocation11 + $0x1c0] ss:$16 sps:$4 sm:$0xff]  }
 0x1a0   :  { %1081 = vmatpush1.bf16.msra.mxu0 %v2899_v56  ;;  %v2965_v56 = vld [vmem:[#allocation8 + $0x14] ss:$8 sps:$4 sm:$0xff]  }
 0x1a1   :  { %1082 = vmatprep.subr.bf16.mxu0 %v2904_v57  ;;  %v2963_v57 = vld [vmem:[#allocation8 + $0x10] ss:$8 sps:$4 sm:$0xff]   ;;  %1366 = vmatprep.subr.bf16.mxu1 %v2965_v56 }
 0x1a2   :  { %v3017_v56 = vld [vmem:[#allocation11 + $0x1e0] ss:$16 sps:$4 sm:$0xff]  }
 0x1a3   :  { %1367 = vmatpush1.bf16.msra.mxu1 %v2963_v57  ;;  %v3022_v57 = vld [vmem:[#allocation11 + $0xc] ss:$16 sps:$4 sm:$0xff]  }
 0x1a4   :  { %1083 = vmatpush1.bf16.msra.mxu0 %v2902_v58  ;;  %v705_v58 = vld [vmem:[%s3640_s4] sm:$0x3] }
 0x1a5   :  { %1084 = vmatprep.subr.bf16.mxu0 %v2907_v59  ;;  %v710_v59 = vrot.slane %v705_v58, %v3565_v39 }
 0x1a8   :  { %1085 = vmatpush1.bf16.msra.mxu0 %v2905_v60  ;;  %v714_v60 = vrot.slane %v705_v58, %v3573_v41  ;;  %v3068_v58 = vld [vmem:[#allocation13] ss:$8 sps:$4 sm:$0xff]  }
 0x1a9   :  { %1086 = vmatprep.subr.bf16.mxu0 %v2910_v61 }
 0x1ac   :  { %1087 = vmatpush1.bf16.msra.mxu0 %v2908_v62 }
 0x1ad   :  { %1088 = vmatprep.subr.bf16.mxu0 %v2913_v63 }
 0x1b0   :  { %1089 = vmatpush1.bf16.msra.mxu0 %v2911_v0 }
 0x1b1   :  { %1090 = vmatprep.subr.bf16.mxu0 %v2916_v1 }
 0x1b4   :  { %1091 = vmatpush1.bf16.msra.mxu0 %v2914_v2 }
 0x1b5   :  { %1092 = vmatprep.subr.bf16.mxu0 %v2919_v3 }
 0x1b8   :  { %1093 = vmatpush1.bf16.msra.mxu0 %v2917_v4 }
 0x1b9   :  { %1094 = vmatprep.subr.bf16.mxu0 %v2922_v5 }
 0x1bc   :  { %1095 = vmatpush1.bf16.msra.mxu0 %v2920_v6 }
 0x1bd   :  { %1096 = vmatprep.subr.bf16.mxu0 %v2925_v7  ;;  %v2968_v7 = vld [vmem:[#allocation8 + $0x24] ss:$8 sps:$4 sm:$0xff]  }
 0x1be   :  { %1368 = vmatprep.subr.bf16.mxu1 %v2968_v7  ;;  %v3086_v7 = vld [vmem:[#allocation13 + $0x60] ss:$8 sps:$4 sm:$0xff]  }
 0x1c0   :  { %1097 = vmatpush1.bf16.msra.mxu0 %v2923_v8  ;;  %v2966_v8 = vld [vmem:[#allocation8 + $0x20] ss:$8 sps:$4 sm:$0xff]  }
 0x1c1   :  { %1098 = vmatprep.subr.bf16.mxu0 %v2928_v9  ;;  %1369 = vmatpush1.bf16.msra.mxu1 %v2966_v8  ;;  %v2971_v9 = vld [vmem:[#allocation8 + $0x34] ss:$8 sps:$4 sm:$0xff]  }
 0x1c2   :  { %1370 = vmatprep.subr.bf16.mxu1 %v2971_v9  ;;  %v3091_v8 = vld [vmem:[#allocation13 + $0x74] ss:$8 sps:$4 sm:$0xff]   ;;  %v3089_v9 = vld [vmem:[#allocation13 + $0x70] ss:$8 sps:$4 sm:$0xff]  }
 0x1c4   :  { %1099 = vmatpush1.bf16.msra.mxu0 %v2926_v10  ;;  %v2969_v10 = vld [vmem:[#allocation8 + $0x30] ss:$8 sps:$4 sm:$0xff]  }
 0x1c5   :  { %1100 = vmatprep.subr.bf16.mxu0 %v2931_v11  ;;  %1371 = vmatpush1.bf16.msra.mxu1 %v2969_v10  ;;  %v3371_v11 = vmov 0   ;;  %v3094_v10 = vld [vmem:[#allocation13 + $0x84] ss:$8 sps:$4 sm:$0xff]  }
 0x1c6   :  { %1396 = vmatprep.mubr.bf16.mxu1 %v3371_v11  ;;  %v3092_v11 = vld [vmem:[#allocation13 + $0x80] ss:$8 sps:$4 sm:$0xff]  }
 0x1c8   :  { %1101 = vmatpush1.bf16.msra.mxu0 %v2929_v12  ;;  %v2974_v12 = vld [vmem:[#allocation11 + $0x4] ss:$16 sps:$4 sm:$0xff]  }
 0x1c9   :  { %1102 = vmatprep.subr.bf16.mxu0 %v2934_v13  ;;  %1815 = vmatprep.subr.bf16.mxu1 %v2974_v12  ;;  %v3097_v12 = vld [vmem:[#allocation13 + $0x94] ss:$8 sps:$4 sm:$0xff]  }
 0x1cc   :  { %1103 = vmatpush1.bf16.msra.mxu0 %v2932_v14  ;;  %v2547_v14 = vld [vmem:[%s3642_s6] ss:$0 sm:$0xff] }
 0x1cd   :  { %1104 = vmatprep.subr.bf16.mxu0 %v2937_v15 }
 0x1d0   :  { %1105 = vmatpush1.bf16.msra.mxu0 %v2935_v17 }
 0x1d1   :  { %1106 = vmatprep.subr.bf16.mxu0 %v2940_v19 }
 0x1d2   :  { %v626_v24 = vpop.f32.mrb[4].mxu1 }
 0x1d3   :  { %v627_v25 = vadd.f32 %v626_v24, %v222_v20  ;;  %v628_v26 = vpop.f32.mrb[5].mxu1  ;;  %v2977_v24 = vld [vmem:[#allocation11 + $0x24] ss:$16 sps:$4 sm:$0xff]  }
 0x1d4   :  { %v629_v27 = vadd.f32 %v628_v26, %v226_v21  ;;  %v630_v28 = vpop.f32.mrb[6].mxu1  ;;  %1107 = vmatpush1.bf16.msra.mxu0 %v2938_v22  ;;  %v2972_v22 = vld [vmem:[#allocation11] ss:$16 sps:$4 sm:$0xff]   ;;  %v2980_v26 = vld [vmem:[#allocation11 + $0x44] ss:$16 sps:$4 sm:$0xff]  }
 0x1d5   :  { %v635_v30 = vmax.f32 %v627_v25, 0.0  ;;  %v631_v31 = vpop.f32.mrb[7].mxu1  ;;  %1108 = vmatprep.subr.bf16.mxu0 %v2943_v23  ;;  %v2975_v25 = vld [vmem:[#allocation11 + $0x20] ss:$16 sps:$4 sm:$0xff]   ;;  %v2983_v28 = vld [vmem:[#allocation11 + $0x64] ss:$16 sps:$4 sm:$0xff]  }
 0x1d6   :  { %v636_v33 = vmax.f32 %v629_v27, 0.0  ;;  %v2978_v27 = vld [vmem:[#allocation11 + $0x40] ss:$16 sps:$4 sm:$0xff]  }
 0x1d7   :  { %v639_v36 = vpack.c.bf16 %v635_v30, %v635_v30  ;;  %v2986_v30 = vld [vmem:[#allocation11 + $0x84] ss:$16 sps:$4 sm:$0xff]   ;;  %v2984_v31 = vld [vmem:[#allocation11 + $0x80] ss:$16 sps:$4 sm:$0xff]  }
 0x1d8   :  { %v640_v34 = vpack.c.bf16 %v636_v33, %v636_v33  ;;  %1109 = vmatpush1.bf16.msra.mxu0 %v2941_v29  ;;  %v2981_v29 = vld [vmem:[#allocation11 + $0x60] ss:$16 sps:$4 sm:$0xff]  }
 0x1d9   :  { %2703 = vmatprep.subr.bf16.mxu0 %v2944_v32  ;;  %v2989_v32 = vld [vmem:[#allocation11 + $0xa4] ss:$16 sps:$4 sm:$0xff]   ;;  %v2987_v33 = vld [vmem:[#allocation11 + $0xa0] ss:$16 sps:$4 sm:$0xff]  }
 0x1da   :  { %1110 = vmatprep.mubr.bf16.mxu0 %v640_v34  ;;  %v2992_v34 = vld [vmem:[#allocation11 + $0xc4] ss:$16 sps:$4 sm:$0xff]  }
 0x1db   :  { %1111 = vmatmul.mubr.bf16.vlgmr.msra.gmra.mrb[0].mxu0 %v639_v36  ;;  %v2995_v36 = vld [vmem:[#allocation11 + $0xe4] ss:$16 sps:$4 sm:$0xff]  }
 0x1dc   :  { %2704 = vmatpush3.bf16.msra.mxu0 %v2945_v35  ;;  %v2990_v35 = vld [vmem:[#allocation11 + $0xc0] ss:$16 sps:$4 sm:$0xff]  }
 0x1dd   :  { %2705 = vmatprep.subr.bf16.mxu0 %v2946_v37  ;;  %v2993_v37 = vld [vmem:[#allocation11 + $0xe0] ss:$16 sps:$4 sm:$0xff]  }
 0x1e0   :  { %2706 = vmatpush3.bf16.msra.mxu0 %v2947_v40  ;;  %v2998_v40 = vld [vmem:[#allocation11 + $0x104] ss:$16 sps:$4 sm:$0xff]  }
 0x1e1   :  { %2707 = vmatprep.subr.bf16.mxu0 %v2948_v42  ;;  %v2996_v42 = vld [vmem:[#allocation11 + $0x100] ss:$16 sps:$4 sm:$0xff]  }
 0x1e4   :  { %2708 = vmatpush3.bf16.msra.mxu0 %v2949_v43  ;;  %v3001_v43 = vld [vmem:[#allocation11 + $0x124] ss:$16 sps:$4 sm:$0xff]  }
 0x1e5   :  { %2709 = vmatprep.subr.bf16.mxu0 %v2950_v44  ;;  %v2999_v44 = vld [vmem:[#allocation11 + $0x120] ss:$16 sps:$4 sm:$0xff]  }
 0x1e8   :  { %2710 = vmatpush3.bf16.msra.mxu0 %v2951_v45  ;;  %v3004_v45 = vld [vmem:[#allocation11 + $0x144] ss:$16 sps:$4 sm:$0xff]  }
 0x1e9   :  { %2711 = vmatprep.subr.bf16.mxu0 %v2952_v46  ;;  %v3002_v46 = vld [vmem:[#allocation11 + $0x140] ss:$16 sps:$4 sm:$0xff]  }
 0x1ec   :  { %2712 = vmatpush3.bf16.msra.mxu0 %v2953_v47  ;;  %v3007_v47 = vld [vmem:[#allocation11 + $0x164] ss:$16 sps:$4 sm:$0xff]  }
 0x1ed   :  { %2713 = vmatprep.subr.bf16.mxu0 %v2954_v48  ;;  %v3005_v48 = vld [vmem:[#allocation11 + $0x160] ss:$16 sps:$4 sm:$0xff]  }
 0x1f0   :  { %2714 = vmatpush3.bf16.msra.mxu0 %v2955_v49  ;;  %v3010_v49 = vld [vmem:[#allocation11 + $0x184] ss:$16 sps:$4 sm:$0xff]  }
 0x1f1   :  { %2715 = vmatprep.subr.bf16.mxu0 %v2956_v50  ;;  %v3008_v50 = vld [vmem:[#allocation11 + $0x180] ss:$16 sps:$4 sm:$0xff]  }
 0x1f4   :  { %2716 = vmatpush3.bf16.msra.mxu0 %v2957_v51  ;;  %v3013_v51 = vld [vmem:[#allocation11 + $0x1a4] ss:$16 sps:$4 sm:$0xff]  }
 0x1f5   :  { %2717 = vmatprep.subr.bf16.mxu0 %v2958_v52  ;;  %v3011_v52 = vld [vmem:[#allocation11 + $0x1a0] ss:$16 sps:$4 sm:$0xff]  }
 0x1f8   :  { %2718 = vmatpush3.bf16.msra.mxu0 %v2959_v53  ;;  %v3016_v53 = vld [vmem:[#allocation11 + $0x1c4] ss:$16 sps:$4 sm:$0xff]  }
 0x2ae   :  { %v1112_v61 = vpop.f32.mrb[0].mxu0 }
 0x2af   :  { %v2725_v62 = vadd.f32 %v1112_v61, %v710_v59  ;;  %v1114_v63 = vpop.f32.mrb[1].mxu0  ;;  %v3070_v59 = vld [vmem:[#allocation13 + $0x4] ss:$8 sps:$4 sm:$0xff]   ;;  %v3071_v61 = vld [vmem:[#allocation13 + $0x10] ss:$8 sps:$4 sm:$0xff]  }
 0x2b0   :  { %v2726_v0 = vadd.f32 %v1114_v63, %v714_v60  ;;  %v1116_v1 = vpop.f32.mrb[2].mxu0  ;;  %v3073_v60 = vld [vmem:[#allocation13 + $0x14] ss:$8 sps:$4 sm:$0xff]   ;;  %2301 = vmatprep.subr.bf16.mxu0 %v3070_v59  ;;  %v3074_v63 = vld [vmem:[#allocation13 + $0x20] ss:$8 sps:$4 sm:$0xff]  }
 0x2b1   :  { %v1119_v2 = vmax.f32 %v2725_v62, 0.0  ;;  %v1117_v3 = vpop.f32.mrb[3].mxu0  ;;  %v3076_v62 = vld [vmem:[#allocation13 + $0x24] ss:$8 sps:$4 sm:$0xff]   ;;  %v3077_v1 = vld [vmem:[#allocation13 + $0x30] ss:$8 sps:$4 sm:$0xff]  }
 0x2b2   :  { %v1120_v4 = vmax.f32 %v2726_v0, 0.0  ;;  %v3079_v0 = vld [vmem:[#allocation13 + $0x34] ss:$8 sps:$4 sm:$0xff]   ;;  %v3080_v3 = vld [vmem:[#allocation13 + $0x40] ss:$8 sps:$4 sm:$0xff]  }
 0x2b3   :  { %v1121_v6 = vpack.c.bf16 %v1119_v2, %v1119_v2  ;;  %v3082_v2 = vld [vmem:[#allocation13 + $0x44] ss:$8 sps:$4 sm:$0xff]  }
 0x2b4   :  { %v1122_v5 = vpack.c.bf16 %v1120_v4, %v1120_v4  ;;  %v3085_v4 = vld [vmem:[#allocation13 + $0x54] ss:$8 sps:$4 sm:$0xff]  }
 0x2b5   :  { %v3052_v59 = vld [vmem:[#allocation11 + $0x14c] ss:$16 sps:$4 sm:$0xff]  }
 0x2b6   :  { %1290 = vmatprep.mubr.bf16.mxu0 %v1122_v5  ;;  %v3083_v5 = vld [vmem:[#allocation13 + $0x50] ss:$8 sps:$4 sm:$0xff]  }
 0x2b7   :  { %1291 = vmatmul.mubr.bf16.vlgmr.msra.gmra.mrb[4].mxu0 %v1121_v6  ;;  %v3088_v6 = vld [vmem:[#allocation13 + $0x64] ss:$8 sps:$4 sm:$0xff]  }
 0x2b8   :  { %2302 = vmatpush1.bf16.msra.mxu0 %v3068_v58  ;;  %v3047_v58 = vld [vmem:[#allocation11 + $0x128] ss:$16 sps:$4 sm:$0xff]  }
 0x2b9   :  { %2303 = vmatprep.subr.bf16.mxu0 %v3073_v60  ;;  %v3050_v60 = vld [vmem:[#allocation11 + $0x148] ss:$16 sps:$4 sm:$0xff]  }
 0x2bc   :  { %2304 = vmatpush1.bf16.msra.mxu0 %v3071_v61  ;;  %v3055_v61 = vld [vmem:[#allocation11 + $0x16c] ss:$16 sps:$4 sm:$0xff]  }
 0x2bd   :  { %2305 = vmatprep.subr.bf16.mxu0 %v3076_v62  ;;  %v3053_v62 = vld [vmem:[#allocation11 + $0x168] ss:$16 sps:$4 sm:$0xff]  }
 0x2c0   :  { %2306 = vmatpush1.bf16.msra.mxu0 %v3074_v63  ;;  %v3058_v63 = vld [vmem:[#allocation11 + $0x18c] ss:$16 sps:$4 sm:$0xff]  }
 0x2c1   :  { %2307 = vmatprep.subr.bf16.mxu0 %v3079_v0  ;;  %v3056_v0 = vld [vmem:[#allocation11 + $0x188] ss:$16 sps:$4 sm:$0xff]  }
 0x2c4   :  { %2308 = vmatpush1.bf16.msra.mxu0 %v3077_v1  ;;  %v3061_v1 = vld [vmem:[#allocation11 + $0x1ac] ss:$16 sps:$4 sm:$0xff]  }
 0x2c5   :  { %2309 = vmatprep.subr.bf16.mxu0 %v3082_v2  ;;  %v3059_v2 = vld [vmem:[#allocation11 + $0x1a8] ss:$16 sps:$4 sm:$0xff]  }
 0x2c8   :  { %2310 = vmatpush1.bf16.msra.mxu0 %v3080_v3  ;;  %v3064_v3 = vld [vmem:[#allocation11 + $0x1cc] ss:$16 sps:$4 sm:$0xff]  }
 0x2c9   :  { %2311 = vmatprep.subr.bf16.mxu0 %v3085_v4  ;;  %v3062_v4 = vld [vmem:[#allocation11 + $0x1c8] ss:$16 sps:$4 sm:$0xff]  }
 0x2cc   :  { %2312 = vmatpush1.bf16.msra.mxu0 %v3083_v5  ;;  %v3067_v5 = vld [vmem:[#allocation11 + $0x1ec] ss:$16 sps:$4 sm:$0xff]  }
 0x2cd   :  { %2313 = vmatprep.subr.bf16.mxu0 %v3088_v6  ;;  %v3065_v6 = vld [vmem:[#allocation11 + $0x1e8] ss:$16 sps:$4 sm:$0xff]  }
 0x2d0   :  { %2314 = vmatpush1.bf16.msra.mxu0 %v3086_v7  ;;  %v3112_v7 = vld [vmem:[#allocation13 + $0xe4] ss:$8 sps:$4 sm:$0xff]  }
 0x2d1   :  { %2315 = vmatprep.subr.bf16.mxu0 %v3091_v8  ;;  %v3110_v8 = vld [vmem:[#allocation13 + $0xe0] ss:$8 sps:$4 sm:$0xff]  }
 0x2d4   :  { %2316 = vmatpush1.bf16.msra.mxu0 %v3089_v9  ;;  %v3115_v9 = vld [vmem:[#allocation13 + $0xf4] ss:$8 sps:$4 sm:$0xff]  }
 0x2d5   :  { %2317 = vmatprep.subr.bf16.mxu0 %v3094_v10  ;;  %v3113_v10 = vld [vmem:[#allocation13 + $0xf0] ss:$8 sps:$4 sm:$0xff]  }
 0x2d8   :  { %2318 = vmatpush1.bf16.msra.mxu0 %v3092_v11  ;;  %v3118_v11 = vld [vmem:[#allocation13 + $0x104] ss:$8 sps:$4 sm:$0xff]  }
 0x2d9   :  { %2319 = vmatprep.subr.bf16.mxu0 %v3097_v12  ;;  %v3607_v12 = vld [vmem:[%s3646_s10] sm:$0xf] }
 0x38a   :  { %v2719_v13 = vpop.f32.mrb[4].mxu0 }
 0x38b   :  { %v2720_v15 = vpop.f32.mrb[5].mxu0 }
 0x38c   :  { %v2721_v17 = vadd.f32 %v2720_v15, %v2719_v13  ;;  %v2722_v19 = vpop.f32.mrb[6].mxu0  ;;  %v3095_v13 = vld [vmem:[#allocation13 + $0x90] ss:$8 sps:$4 sm:$0xff]   ;;  %v3098_v15 = vld [vmem:[#allocation13 + $0xa0] ss:$8 sps:$4 sm:$0xff]  }
 0x38d   :  { %v2723_v20 = vpop.f32.mrb[7].mxu0  ;;  %2320 = vmatpush1.bf16.msra.mxu0 %v3095_v13  ;;  %v3101_v19 = vld [vmem:[#allocation13 + $0xb0] ss:$8 sps:$4 sm:$0xff]   ;;  %v1478_v13 = vrot.slane %v3607_v12, %v3565_v39 }
 0x38e   :  { %v1293_v21 = vadd.f32 %v2721_v17, %v2547_v14  ;;  %v3100_v14 = vld [vmem:[#allocation13 + $0xa4] ss:$8 sps:$4 sm:$0xff]   ;;  %v3103_v17 = vld [vmem:[#allocation13 + $0xb4] ss:$8 sps:$4 sm:$0xff]  }
 0x38f   :  { %2321 = vmatprep.subr.bf16.mxu0 %v3100_v14  ;;  %v3106_v20 = vld [vmem:[#allocation13 + $0xc4] ss:$8 sps:$4 sm:$0xff]   ;;  %v1482_v14 = vrot.slane %v3607_v12, %v3573_v41 }
 0x390   :  { %1298 = vst [vmem:[%s3650_s14] sm:$0xff] %v1293_v21  ;;  %v1299_v23 = vpack.c.bf16 %v1293_v21, %v1293_v21  ;;  %v3104_v21 = vld [vmem:[#allocation13 + $0xc0] ss:$8 sps:$4 sm:$0xff]  }
 0x391   :  { %2322 = vmatpush1.bf16.msra.mxu0 %v3098_v15 }
 0x392   :  { %2572 = vmatmul.mubr.msk.bf16.vlgmr.msra.gmra.mrb[8].mxu1 %vm1360_vm0, %v1299_v23  ;;  %2323 = vmatprep.subr.bf16.mxu0 %v3103_v17  ;;  %v1308_v23 = vld [vmem:[#allocation10] sm:$0x3] }
 0x393   :  { %1816 = vmatpush1.bf16.msra.mxu1 %v2972_v22  ;;  %v3109_v22 = vld [vmem:[#allocation13 + $0xd4] ss:$8 sps:$4 sm:$0xff]  }
 0x394   :  { %1817 = vmatprep.subr.bf16.mxu1 %v2977_v24  ;;  %v3107_v24 = vld [vmem:[#allocation13 + $0xd0] ss:$8 sps:$4 sm:$0xff]  }
 0x395   :  { %2324 = vmatpush1.bf16.msra.mxu0 %v3101_v19 }
 0x396   :  { %2325 = vmatprep.subr.bf16.mxu0 %v3106_v20 }
 0x397   :  { %1818 = vmatpush1.bf16.msra.mxu1 %v2975_v25  ;;  %v1313_v25 = vrot.slane %v1308_v23, %v3565_v39 }
 0x398   :  { %1819 = vmatprep.subr.bf16.mxu1 %v2980_v26  ;;  %v1317_v26 = vrot.slane %v1308_v23, %v3573_v41 }
 0x399   :  { %2326 = vmatpush1.bf16.msra.mxu0 %v3104_v21 }
 0x39a   :  { %2327 = vmatprep.subr.bf16.mxu0 %v3109_v22 }
 0x39b   :  { %1820 = vmatpush1.bf16.msra.mxu1 %v2978_v27 }
 0x39c   :  { %1821 = vmatprep.subr.bf16.mxu1 %v2983_v28 }
 0x39d   :  { %2328 = vmatpush1.bf16.msra.mxu0 %v3107_v24 }
 0x39e   :  { %2329 = vmatprep.subr.bf16.mxu0 %v3112_v7 }
 0x39f   :  { %1822 = vmatpush1.bf16.msra.mxu1 %v2981_v29 }
 0x3a0   :  { %1823 = vmatprep.subr.bf16.mxu1 %v2986_v30 }
 0x3a1   :  { %2330 = vmatpush1.bf16.msra.mxu0 %v3110_v8  ;;  %v1978_v8 = vrot.slane %v1969_v38, %v3573_v41 }
 0x3a2   :  { %2331 = vmatprep.subr.bf16.mxu0 %v3115_v9 }
 0x3a3   :  { %1824 = vmatpush1.bf16.msra.mxu1 %v2984_v31 }
 0x3a4   :  { %1825 = vmatprep.subr.bf16.mxu1 %v2989_v32 }
 0x3a5   :  { %2332 = vmatpush1.bf16.msra.mxu0 %v3113_v10 }
 0x3a6   :  { %2342 = vmatprep.subr.bf16.mxu0 %v3118_v11 }
 0x3a7   :  { %1826 = vmatpush1.bf16.msra.mxu1 %v2987_v33 }
 0x3a8   :  { %1827 = vmatprep.subr.bf16.mxu1 %v2992_v34 }
 0x3ab   :  { %1828 = vmatpush1.bf16.msra.mxu1 %v2990_v35 }
 0x3ac   :  { %1829 = vmatprep.subr.bf16.mxu1 %v2995_v36  ;;  %v3020_v36 = vld [vmem:[#allocation11 + $0x8] ss:$16 sps:$4 sm:$0xff]  }
 0x3af   :  { %1830 = vmatpush1.bf16.msra.mxu1 %v2993_v37 }
 0x3b0   :  { %1831 = vmatprep.subr.bf16.mxu1 %v2998_v40  ;;  %v3025_v40 = vld [vmem:[#allocation11 + $0x2c] ss:$16 sps:$4 sm:$0xff]  }
 0x3b3   :  { %1832 = vmatpush1.bf16.msra.mxu1 %v2996_v42  ;;  %v3023_v42 = vld [vmem:[#allocation11 + $0x28] ss:$16 sps:$4 sm:$0xff]  }
 0x3b4   :  { %1833 = vmatprep.subr.bf16.mxu1 %v3001_v43  ;;  %v3028_v43 = vld [vmem:[#allocation11 + $0x4c] ss:$16 sps:$4 sm:$0xff]  }
 0x3b7   :  { %1834 = vmatpush1.bf16.msra.mxu1 %v2999_v44  ;;  %v3026_v44 = vld [vmem:[#allocation11 + $0x48] ss:$16 sps:$4 sm:$0xff]  }
 0x3b8   :  { %1835 = vmatprep.subr.bf16.mxu1 %v3004_v45  ;;  %v3031_v45 = vld [vmem:[#allocation11 + $0x6c] ss:$16 sps:$4 sm:$0xff]  }
 0x3bb   :  { %1836 = vmatpush1.bf16.msra.mxu1 %v3002_v46  ;;  %v3029_v46 = vld [vmem:[#allocation11 + $0x68] ss:$16 sps:$4 sm:$0xff]  }
 0x3bc   :  { %1837 = vmatprep.subr.bf16.mxu1 %v3007_v47  ;;  %v3034_v47 = vld [vmem:[#allocation11 + $0x8c] ss:$16 sps:$4 sm:$0xff]  }
 0x3bf   :  { %1838 = vmatpush1.bf16.msra.mxu1 %v3005_v48  ;;  %v3032_v48 = vld [vmem:[#allocation11 + $0x88] ss:$16 sps:$4 sm:$0xff]  }
 0x3c0   :  { %1839 = vmatprep.subr.bf16.mxu1 %v3010_v49  ;;  %v3037_v49 = vld [vmem:[#allocation11 + $0xac] ss:$16 sps:$4 sm:$0xff]  }
 0x3c3   :  { %1840 = vmatpush1.bf16.msra.mxu1 %v3008_v50  ;;  %v3035_v50 = vld [vmem:[#allocation11 + $0xa8] ss:$16 sps:$4 sm:$0xff]  }
 0x3c4   :  { %1841 = vmatprep.subr.bf16.mxu1 %v3013_v51  ;;  %v3040_v51 = vld [vmem:[#allocation11 + $0xcc] ss:$16 sps:$4 sm:$0xff]  }
 0x3c7   :  { %1842 = vmatpush1.bf16.msra.mxu1 %v3011_v52  ;;  %v3038_v52 = vld [vmem:[#allocation11 + $0xc8] ss:$16 sps:$4 sm:$0xff]  }
 0x3c8   :  { %1843 = vmatprep.subr.bf16.mxu1 %v3016_v53  ;;  %v3043_v53 = vld [vmem:[#allocation11 + $0xec] ss:$16 sps:$4 sm:$0xff]  }
 0x3cb   :  { %1844 = vmatpush1.bf16.msra.mxu1 %v3014_v54  ;;  %v3041_v54 = vld [vmem:[#allocation11 + $0xe8] ss:$16 sps:$4 sm:$0xff]  }
 0x3cc   :  { %1845 = vmatprep.subr.bf16.mxu1 %v3019_v55  ;;  %v3046_v55 = vld [vmem:[#allocation11 + $0x10c] ss:$16 sps:$4 sm:$0xff]  }
 0x3cf   :  { %1846 = vmatpush1.bf16.msra.mxu1 %v3017_v56  ;;  %v3044_v56 = vld [vmem:[#allocation11 + $0x108] ss:$16 sps:$4 sm:$0xff]  }
 0x3d0   :  { %1856 = vmatprep.subr.bf16.mxu1 %v3022_v57  ;;  %v3049_v57 = vld [vmem:[#allocation11 + $0x12c] ss:$16 sps:$4 sm:$0xff]  }
 0x465   :  { %v1398_v27 = vpop.f32.mrb[8].mxu1 }
 0x466   :  { %v1399_v28 = vadd.f32 %v1398_v27, %v1313_v25  ;;  %v1400_v29 = vpop.f32.mrb[9].mxu1 }
 0x467   :  { %v1401_v30 = vadd.f32 %v1400_v29, %v1317_v26  ;;  %v1402_v31 = vpop.f32.mrb[10].mxu1  ;;  %v3116_v26 = vld [vmem:[#allocation13 + $0x100] ss:$8 sps:$4 sm:$0xff]   ;;  %v3119_v29 = vld [vmem:[#allocation13 + $0x110] ss:$8 sps:$4 sm:$0xff]  }
 0x468   :  { %v1405_v32 = vmax.f32 %v1399_v28, 0.0  ;;  %v1403_v33 = vpop.f32.mrb[11].mxu1  ;;  %v3121_v28 = vld [vmem:[#allocation13 + $0x114] ss:$8 sps:$4 sm:$0xff]   ;;  %v3122_v31 = vld [vmem:[#allocation13 + $0x120] ss:$8 sps:$4 sm:$0xff]  }
 0x469   :  { %v1406_v34 = vmax.f32 %v1401_v30, 0.0  ;;  %v3124_v30 = vld [vmem:[#allocation13 + $0x124] ss:$8 sps:$4 sm:$0xff]   ;;  %v3125_v33 = vld [vmem:[#allocation13 + $0x130] ss:$8 sps:$4 sm:$0xff]  }
 0x46a   :  { %v3600_v37 = vpack.c.bf16 %v1405_v32, %v1405_v32  ;;  %v3127_v32 = vld [vmem:[#allocation13 + $0x134] ss:$8 sps:$4 sm:$0xff]  }
 0x46b   :  { %v1408_v35 = vpack.c.bf16 %v1406_v34, %v1406_v34  ;;  %v3130_v34 = vld [vmem:[#allocation13 + $0x144] ss:$8 sps:$4 sm:$0xff]  }
 0x46d   :  { %1847 = vmatprep.mubr.bf16.mxu1 %v1408_v35 }
 0x46e   :  { %1848 = vmatmul.mubr.bf16.vlgmr.msra.gmra.mrb[12].mxu1 %v3600_v37 }
 0x46f   :  { %1857 = vmatpush1.bf16.msra.mxu1 %v3020_v36  ;;  %1888 = vmatprep.mubr.bf16.mxu1 %v1408_v35  ;;  %v3128_v35 = vld [vmem:[#allocation13 + $0x140] ss:$8 sps:$4 sm:$0xff]   ;;  %v3133_v36 = vld [vmem:[#allocation13 + $0x154] ss:$8 sps:$4 sm:$0xff]  }
 0x470   :  { %1858 = vmatprep.subr.bf16.mxu1 %v3025_v40  ;;  %v3136_v40 = vld [vmem:[#allocation13 + $0x164] ss:$8 sps:$4 sm:$0xff]  }
 0x473   :  { %1859 = vmatpush1.bf16.msra.mxu1 %v3023_v42  ;;  %v3134_v42 = vld [vmem:[#allocation13 + $0x160] ss:$8 sps:$4 sm:$0xff]  }
 0x474   :  { %1860 = vmatprep.subr.bf16.mxu1 %v3028_v43  ;;  %v3139_v43 = vld [vmem:[#allocation13 + $0x174] ss:$8 sps:$4 sm:$0xff]  }
 0x477   :  { %1861 = vmatpush1.bf16.msra.mxu1 %v3026_v44  ;;  %v3137_v44 = vld [vmem:[#allocation13 + $0x170] ss:$8 sps:$4 sm:$0xff]  }
 0x478   :  { %1862 = vmatprep.subr.bf16.mxu1 %v3031_v45  ;;  %v3142_v45 = vld [vmem:[#allocation13 + $0x184] ss:$8 sps:$4 sm:$0xff]  }
 0x47b   :  { %1863 = vmatpush1.bf16.msra.mxu1 %v3029_v46  ;;  %v3140_v46 = vld [vmem:[#allocation13 + $0x180] ss:$8 sps:$4 sm:$0xff]  }
 0x47c   :  { %1864 = vmatprep.subr.bf16.mxu1 %v3034_v47  ;;  %v3145_v47 = vld [vmem:[#allocation13 + $0x194] ss:$8 sps:$4 sm:$0xff]  }
 0x47f   :  { %1865 = vmatpush1.bf16.msra.mxu1 %v3032_v48  ;;  %v3143_v48 = vld [vmem:[#allocation13 + $0x190] ss:$8 sps:$4 sm:$0xff]  }
 0x480   :  { %1866 = vmatprep.subr.bf16.mxu1 %v3037_v49  ;;  %v3148_v49 = vld [vmem:[#allocation13 + $0x1a4] ss:$8 sps:$4 sm:$0xff]  }
 0x483   :  { %1867 = vmatpush1.bf16.msra.mxu1 %v3035_v50  ;;  %v3146_v50 = vld [vmem:[#allocation13 + $0x1a0] ss:$8 sps:$4 sm:$0xff]  }
 0x484   :  { %1868 = vmatprep.subr.bf16.mxu1 %v3040_v51  ;;  %v3151_v51 = vld [vmem:[#allocation13 + $0x1b4] ss:$8 sps:$4 sm:$0xff]  }
 0x487   :  { %1869 = vmatpush1.bf16.msra.mxu1 %v3038_v52  ;;  %v3149_v52 = vld [vmem:[#allocation13 + $0x1b0] ss:$8 sps:$4 sm:$0xff]  }
 0x488   :  { %1870 = vmatprep.subr.bf16.mxu1 %v3043_v53  ;;  %v3154_v53 = vld [vmem:[#allocation13 + $0x1c4] ss:$8 sps:$4 sm:$0xff]  }
 0x48b   :  { %1871 = vmatpush1.bf16.msra.mxu1 %v3041_v54  ;;  %v3152_v54 = vld [vmem:[#allocation13 + $0x1c0] ss:$8 sps:$4 sm:$0xff]  }
 0x48c   :  { %1872 = vmatprep.subr.bf16.mxu1 %v3046_v55  ;;  %v3157_v55 = vld [vmem:[#allocation13 + $0x1d4] ss:$8 sps:$4 sm:$0xff]  }
 0x48f   :  { %1873 = vmatpush1.bf16.msra.mxu1 %v3044_v56  ;;  %v3155_v56 = vld [vmem:[#allocation13 + $0x1d0] ss:$8 sps:$4 sm:$0xff]  }
 0x490   :  { %1874 = vmatprep.subr.bf16.mxu1 %v3049_v57  ;;  %v3160_v57 = vld [vmem:[#allocation13 + $0x1e4] ss:$8 sps:$4 sm:$0xff]  }
 0x493   :  { %1875 = vmatpush1.bf16.msra.mxu1 %v3047_v58  ;;  %v1486_v58 = vrot.slane %v3607_v12, %v221_v16 }
 0x494   :  { %1876 = vmatprep.subr.bf16.mxu1 %v3052_v59  ;;  %v1490_v59 = vrot.slane %v3607_v12, %v225_v18  ;;  %v1974_v18 = vrot.slane %v1969_v38, %v3565_v39 }
 0x497   :  { %1877 = vmatpush1.bf16.msra.mxu1 %v3050_v60  ;;  %v3158_v60 = vld [vmem:[#allocation13 + $0x1e0] ss:$8 sps:$4 sm:$0xff]  }
 0x498   :  { %1878 = vmatprep.subr.bf16.mxu1 %v3055_v61  ;;  %v3163_v61 = vld [vmem:[#allocation13 + $0x1f4] ss:$8 sps:$4 sm:$0xff]  }
 0x49b   :  { %1879 = vmatpush1.bf16.msra.mxu1 %v3053_v62 }
 0x49c   :  { %1880 = vmatprep.subr.bf16.mxu1 %v3058_v63 }
 0x49f   :  { %1881 = vmatpush1.bf16.msra.mxu1 %v3056_v0 }
 0x4a0   :  { %1882 = vmatprep.subr.bf16.mxu1 %v3061_v1 }
 0x4a3   :  { %1883 = vmatpush1.bf16.msra.mxu1 %v3059_v2 }
 0x4a4   :  { %1884 = vmatprep.subr.bf16.mxu1 %v3064_v3  ;;  %v3161_v3 = vld [vmem:[#allocation13 + $0x1f0] ss:$8 sps:$4 sm:$0xff]  }
 0x4a7   :  { %1885 = vmatpush1.bf16.msra.mxu1 %v3062_v4 }
 0x4a8   :  { %1886 = vmatprep.subr.bf16.mxu1 %v3067_v5 }
 0x4ab   :  { %1887 = vmatpush1.bf16.msra.mxu1 %v3065_v6 }
 0x4ae   :  { %1889 = vmatmul.mubr.bf16.vlgmr.msra.gmra.mrb[16].mxu1 %v3600_v37  ;;  %v3131_v37 = vld [vmem:[#allocation13 + $0x150] ss:$8 sps:$4 sm:$0xff]  }
 0x541   :  { %v1849_v15 = vpop.f32.mrb[12].mxu1 }
 0x542   :  { %v1850_v17 = vadd.f32 %v1849_v15, %v1478_v13  ;;  %v1851_v19 = vpop.f32.mrb[13].mxu1 }
 0x543   :  { %v1852_v20 = vadd.f32 %v1851_v19, %v1482_v14  ;;  %v1853_v21 = vpop.f32.mrb[14].mxu1 }
 0x544   :  { %v1897_v22 = vmax.f32 %v1850_v17, 0.0  ;;  %v1854_v23 = vpop.f32.mrb[15].mxu1 }
 0x545   :  { %v1898_v24 = vmax.f32 %v1852_v20, 0.0 }
 0x546   :  { %v1901_v27 = vpack.c.bf16 %v1897_v22, %v1897_v22 }
 0x547   :  { %v1902_v25 = vpack.c.bf16 %v1898_v24, %v1898_v24 }
 0x549   :  { %2333 = vmatprep.mubr.bf16.mxu0 %v1902_v25 }
 0x54a   :  { %2334 = vmatmul.mubr.bf16.vlgmr.msra.gmra.mrb[8].mxu0 %v1901_v27 }
 0x54b   :  { %2343 = vmatpush1.bf16.msra.mxu0 %v3116_v26 }
 0x54c   :  { %2344 = vmatprep.subr.bf16.mxu0 %v3121_v28 }
 0x54f   :  { %2345 = vmatpush1.bf16.msra.mxu0 %v3119_v29 }
 0x550   :  { %2346 = vmatprep.subr.bf16.mxu0 %v3124_v30 }
 0x553   :  { %2347 = vmatpush1.bf16.msra.mxu0 %v3122_v31 }
 0x554   :  { %2348 = vmatprep.subr.bf16.mxu0 %v3127_v32 }
 0x557   :  { %2349 = vmatpush1.bf16.msra.mxu0 %v3125_v33 }
 0x558   :  { %2350 = vmatprep.subr.bf16.mxu0 %v3130_v34 }
 0x55b   :  { %2351 = vmatpush1.bf16.msra.mxu0 %v3128_v35 }
 0x55c   :  { %2352 = vmatprep.subr.bf16.mxu0 %v3133_v36 }
 0x55f   :  { %2353 = vmatpush1.bf16.msra.mxu0 %v3131_v37 }
 0x560   :  { %2354 = vmatprep.subr.bf16.mxu0 %v3136_v40 }
 0x563   :  { %2355 = vmatpush1.bf16.msra.mxu0 %v3134_v42 }
 0x564   :  { %2356 = vmatprep.subr.bf16.mxu0 %v3139_v43 }
 0x567   :  { %2357 = vmatpush1.bf16.msra.mxu0 %v3137_v44 }
 0x568   :  { %2358 = vmatprep.subr.bf16.mxu0 %v3142_v45 }
 0x56b   :  { %2359 = vmatpush1.bf16.msra.mxu0 %v3140_v46 }
 0x56c   :  { %2360 = vmatprep.subr.bf16.mxu0 %v3145_v47 }
 0x56f   :  { %2361 = vmatpush1.bf16.msra.mxu0 %v3143_v48 }
 0x570   :  { %2362 = vmatprep.subr.bf16.mxu0 %v3148_v49 }
 0x573   :  { %2363 = vmatpush1.bf16.msra.mxu0 %v3146_v50 }
 0x574   :  { %2364 = vmatprep.subr.bf16.mxu0 %v3151_v51 }
 0x577   :  { %2365 = vmatpush1.bf16.msra.mxu0 %v3149_v52 }
 0x578   :  { %2366 = vmatprep.subr.bf16.mxu0 %v3154_v53 }
 0x57b   :  { %2367 = vmatpush1.bf16.msra.mxu0 %v3152_v54 }
 0x57c   :  { %2368 = vmatprep.subr.bf16.mxu0 %v3157_v55 }
 0x57f   :  { %2369 = vmatpush1.bf16.msra.mxu0 %v3155_v56 }
 0x580   :  { %2370 = vmatprep.subr.bf16.mxu0 %v3160_v57 }
 0x581   :  { %v1890_v62 = vpop.f32.mrb[16].mxu1 }
 0x582   :  { %v1891_v63 = vadd.f32 %v1890_v62, %v1486_v58  ;;  %v1892_v0 = vpop.f32.mrb[17].mxu1 }
 0x583   :  { %v1893_v1 = vadd.f32 %v1892_v0, %v1490_v59  ;;  %v1894_v2 = vpop.f32.mrb[18].mxu1  ;;  %2371 = vmatpush1.bf16.msra.mxu0 %v3158_v60 }
 0x584   :  { %v1899_v4 = vmax.f32 %v1891_v63, 0.0  ;;  %v1895_v5 = vpop.f32.mrb[19].mxu1  ;;  %2372 = vmatprep.subr.bf16.mxu0 %v3163_v61 }
 0x585   :  { %v1900_v6 = vmax.f32 %v1893_v1, 0.0 }
 0x586   :  { %v1903_v7 = vpack.c.bf16 %v1899_v4, %v1899_v4 }
 0x587   :  { %v1904_v16 = vpack.c.bf16 %v1900_v6, %v1900_v6  ;;  %2373 = vmatpush1.bf16.msra.mxu0 %v3161_v3 }
 0x589   :  { %2374 = vmatprep.mubr.bf16.mxu0 %v1904_v16 }
 0x58a   :  { %2375 = vmatmul.mubr.bf16.vlgmr.msra.gmra.mrb[8].mxu0 %v1903_v7 }
 0x65d   :  { %v2376_v9 = vpop.f32.mrb[8].mxu0 }
 0x65e   :  { %v2727_v10 = vadd.f32 %v2376_v9, %v1974_v18  ;;  %v2378_v11 = vpop.f32.mrb[9].mxu0 }
 0x65f   :  { %v2728_v12 = vadd.f32 %v2378_v11, %v1978_v8  ;;  %v2380_v13 = vpop.f32.mrb[10].mxu0 }
 0x660   :  { %v2701_v14 = vmul.f32 -1.442695, %v2727_v10  ;;  %v2381_v15 = vpop.f32.mrb[11].mxu0 }
 0x661   :  { %v2702_v17 = vmul.f32 -1.442695, %v2728_v12 }
 0x662   :  { %3164 = vpow2.f32 %v2701_v14 }
 0x663   :  { %3166 = vpow2.f32 %v2702_v17 }
 0x66c   :  { %v3165_v19 = vpop.eup %3164 }
 0x66d   :  { %v3167_v20 = vpop.eup %3166  ;;  %v2389_v21 = vadd.f32 1.0, %v3165_v19 }
 0x66e   :  { %v2390_v22 = vadd.f32 1.0, %v3167_v20 }
 0x66f   :  { %3168 = vrcp.f32 %v2389_v21 }
 0x670   :  { %3170 = vrcp.f32 %v2390_v22 }
 0x679   :  { %v3169_v39 = vpop.eup %3168 }
 0x67a   :  { %v3171_v41 = vpop.eup %3170  ;;  %2395 = vst [vmem:[#allocation14] sm:$0xff] %v3169_v39 }
 0x67b   :  { %2396 = vst [vmem:[#allocation14 + $0x8] sm:$0xff] %v3171_v41 }
 0x67c   :  { %3337 = shalt.err (!%p3334_p4)
}
 0x67d   :  { %s3338_s1 = scalar_lea.hbm %s3649_s13, 256 }
 0x67e   :  { %p3339_p5 = scmp.ne.s32.totalorder %s3649_s13, %s3338_s1  ;;  %p3342_p6 = scmp.lt.u32.totalorder %s3338_s1, %s3649_s13 }
 0x680   :  { %p3344_p7 = pnand %p3342_p6, %p3339_p5 }
 0x682   :  { %3347 = shalt.err (!%p3344_p7)
}
 0x683   :  { %2406 = dma.vmem_to_hbm [thread:$0]  %s2404_s5, 256, %s3649_s13, [#allocation4]  }
 0x684   :  { %3356 = dma.done.wait [#allocation4], 256  }
 0x685   :  { %3357 = vsyncadd [#allocation4], 4294967040 }
 0x686   :  { %2414 = vsyncpa [#allocation3], 1 }
 0x687   :  { %2415 = vsyncpa [#allocation6], 1 }
 0x688   :  { %2416 = vsyncpa [#allocation9], 1 }
 0x689   :  { %2417 = vsyncpa [#allocation12], 1 }
 0x68a   :  { %2418 = vsyncpa [#allocation4], 1 }

</bundles_post_ra>
